<compile_context>
chip_gen: v5e
topology: v5e:2x2
jax: 0.10.0
libtpu: 0.0.40
codegen_flags: <defaults>
</compile_context>

<pallas_src>
import math
from functools import partial

import jax
import jax.numpy as jnp
from jax.experimental import pallas as pl
from jax.experimental.pallas import tpu as pltpu

EPS = 1e-6


# ----------------------------- fused encoder-stack kernel -----------------------------


def _layer_norm(x, a, b):
    # Matches the PyTorch LayerNorm class: unbiased std, divide by (std + eps).
    d = x.shape[-1]
    mean = jnp.mean(x, axis=-1, keepdims=True)
    diff = x - mean
    var = jnp.sum(diff * diff, axis=-1, keepdims=True) * (1.0 / (d - 1))
    std = jnp.sqrt(var)
    return a * diff * pl.reciprocal(std + EPS, approx=True) + b


def _softmax_rows(s):
    m = jnp.max(s, axis=-1, keepdims=True)
    e = jnp.exp(s - m)
    return e * pl.reciprocal(jnp.sum(e, axis=-1, keepdims=True), approx=True)


def _encoder_stack_kernel(
    x_ref, bias_ref,
    ln0a_ref, ln0b_ref, wqkv_ref, bqkv_ref, wo_ref, bo_ref,
    ln1a_ref, ln1b_ref, w1_ref, b1_ref, w2_ref, b2_ref,
    fna_ref, fnb_ref,
    o_ref,
    *, h, scale,
):
    layer = pl.program_id(1)
    n_layers = pl.num_programs(1)

    # Layer 0: load the input activation into the (VMEM-resident) output block.
    @pl.when(layer == 0)
    def _():
        o_ref[...] = x_ref[...]

    act = o_ref[0]          # (S, D) float32, resident across the layer loop
    bias = bias_ref[0]      # (S, S) additive mask bias (-1e9 where masked)

    d_model = act.shape[-1]
    dk = d_model // h

    # ---- self-attention sublayer: x + Wo(Attn(LN(x))) ----
    xn = _layer_norm(act, ln0a_ref[0], ln0b_ref[0])
    qkv = jnp.dot(xn, wqkv_ref[0], preferred_element_type=jnp.float32) + bqkv_ref[0]

    head_outs = []
    for i in range(h):                       # static unrolled head loop (in VMEM)
        qh = qkv[:, i * dk:(i + 1) * dk]
        kh = qkv[:, d_model + i * dk:d_model + (i + 1) * dk]
        vh = qkv[:, 2 * d_model + i * dk:2 * d_model + (i + 1) * dk]
        scores = jax.lax.dot_general(
            qh, kh, (((1,), (1,)), ((), ())),
            preferred_element_type=jnp.float32,
        ) * scale + bias
        p = _softmax_rows(scores)
        head_outs.append(jnp.dot(p, vh, preferred_element_type=jnp.float32))
    ctx = jnp.concatenate(head_outs, axis=-1)                   # (S, D)

    act = act + jnp.dot(ctx, wo_ref[0], preferred_element_type=jnp.float32) + bo_ref[0]

    # ---- feed-forward sublayer: x + W2(relu(W1(LN(x)))) ----
    xn = _layer_norm(act, ln1a_ref[0], ln1b_ref[0])
    hid = jnp.maximum(
        jnp.dot(xn, w1_ref[0], preferred_element_type=jnp.float32) + b1_ref[0], 0.0)
    act = act + jnp.dot(hid, w2_ref[0], preferred_element_type=jnp.float32) + b2_ref[0]

    @pl.when(layer < n_layers - 1)
    def _():
        o_ref[0] = act

    # Final Encoder.norm fused into the last layer step.
    @pl.when(layer == n_layers - 1)
    def _():
        o_ref[0] = _layer_norm(act, fna_ref[...], fnb_ref[...])


def encoder_forward(params, x, mask=None, *, h):
    """Encoder.forward(x, mask) -> LayerNorm(layer_N(...layer_1(x, mask)...))."""
    B, S, D = x.shape
    n_layers, _, d_ff = params["w1"].shape
    scale = 1.0 / math.sqrt(D // h)

    if mask is None:
        bias = jnp.zeros((B, S, S), jnp.float32)
    else:
        bias = jnp.broadcast_to(
            jnp.where(mask == 0, jnp.float32(-1e9), jnp.float32(0.0)), (B, S, S)
        ).astype(jnp.float32)

    layer_w = lambda b, l: (l, 0, 0)    # per-layer stacked weights
    per_batch = lambda b, l: (b, 0, 0)  # per-batch activation / mask block
    shared = lambda b, l: (0, 0)        # final-norm params

    return pl.pallas_call(
        partial(_encoder_stack_kernel, h=h, scale=scale),
        grid=(B, n_layers),
        in_specs=[
            pl.BlockSpec((1, S, D), per_batch),          # x
            pl.BlockSpec((1, S, S), per_batch),          # additive mask bias
            pl.BlockSpec((1, 1, D), layer_w),            # ln0_a
            pl.BlockSpec((1, 1, D), layer_w),            # ln0_b
            pl.BlockSpec((1, D, 3 * D), layer_w),        # wqkv (fused)
            pl.BlockSpec((1, 1, 3 * D), layer_w),        # bqkv
            pl.BlockSpec((1, D, D), layer_w),            # wo
            pl.BlockSpec((1, 1, D), layer_w),            # bo
            pl.BlockSpec((1, 1, D), layer_w),            # ln1_a
            pl.BlockSpec((1, 1, D), layer_w),            # ln1_b
            pl.BlockSpec((1, D, d_ff), layer_w),         # w1
            pl.BlockSpec((1, 1, d_ff), layer_w),         # b1
            pl.BlockSpec((1, d_ff, D), layer_w),         # w2
            pl.BlockSpec((1, 1, D), layer_w),            # b2
            pl.BlockSpec((1, D), shared),                # final norm a
            pl.BlockSpec((1, D), shared),                # final norm b
        ],
        out_specs=pl.BlockSpec((1, S, D), per_batch),    # resident across layers
        out_shape=jax.ShapeDtypeStruct((B, S, D), jnp.float32),
        compiler_params=pltpu.CompilerParams(
            dimension_semantics=("parallel", "arbitrary")),
    )(
        x, bias,
        params["ln0_a"], params["ln0_b"], params["wqkv"], params["bqkv"],
        params["wo"], params["bo"], params["ln1_a"], params["ln1_b"],
        params["w1"], params["b1"], params["w2"], params["b2"],
        params["norm_a"], params["norm_b"],
    )


# ----------------------------- pure-JAX reference (for verification) -----------------------------


def encoder_reference(params, x, mask, *, h):
    B, S, D = x.shape
    dk = D // h
    n_layers = params["wqkv"].shape[0]
    bias = jnp.broadcast_to(
        jnp.where(mask == 0, jnp.float32(-1e9), jnp.float32(0.0)), (B, S, S))

    def ln(t, a, b):
        mean = jnp.mean(t, -1, keepdims=True)
        diff = t - mean
        var = jnp.sum(diff * diff, -1, keepdims=True) / (D - 1)
        return a.reshape(1, 1, D) * diff / (jnp.sqrt(var) + EPS) + b.reshape(1, 1, D)

    act = x
    for l in range(n_layers):
        xn = ln(act, params["ln0_a"][l], params["ln0_b"][l])
        qkv = xn @ params["wqkv"][l] + params["bqkv"][l]
        q, k, v = qkv[..., :D], qkv[..., D:2 * D], qkv[..., 2 * D:]
        split = lambda t: t.reshape(B, S, h, dk).transpose(0, 2, 1, 3)
        q, k, v = split(q), split(k), split(v)
        s = jnp.einsum("bhqd,bhkd->bhqk", q, k) / math.sqrt(dk) + bias[:, None]
        p = jax.nn.softmax(s, axis=-1)
        ctx = jnp.einsum("bhqk,bhkd->bhqd", p, v).transpose(0, 2, 1, 3).reshape(B, S, D)
        act = act + ctx @ params["wo"][l] + params["bo"][l]
        xn = ln(act, params["ln1_a"][l], params["ln1_b"][l])
        hid = jnp.maximum(xn @ params["w1"][l] + params["b1"][l], 0.0)
        act = act + hid @ params["w2"][l] + params["b2"][l]
    return ln(act, params["norm_a"][0], params["norm_b"][0])


# ----------------------------- parameter init -----------------------------


def init_params(key, n_layers, d_model, d_ff):
    keys = iter(jax.random.split(key, n_layers * 6 + 1))

    def xavier(shape):
        limit = math.sqrt(6.0 / (shape[0] + shape[1]))
        return jax.random.uniform(next(keys), shape, jnp.float32, -limit, limit)

    ln0_a, ln0_b, ln1_a, ln1_b = [], [], [], []
    wqkv, bqkv, wo, bo, w1, b1, w2, b2 = ([] for _ in range(8))
    for _ in range(n_layers):
        wq, wk, wv = (xavier((d_model, d_model)) for _ in range(3))
        wqkv.append(jnp.concatenate([wq, wk, wv], axis=1))
        bqkv.append(jnp.zeros((1, 3 * d_model), jnp.float32))
        wo.append(xavier((d_model, d_model)))
        bo.append(jnp.zeros((1, d_model), jnp.float32))
        w1.append(xavier((d_model, d_ff)))
        b1.append(jnp.zeros((1, d_ff), jnp.float32))
        w2.append(xavier((d_ff, d_model)))
        b2.append(jnp.zeros((1, d_model), jnp.float32))
        ln0_a.append(jnp.ones((1, d_model), jnp.float32))
        ln0_b.append(jnp.zeros((1, d_model), jnp.float32))
        ln1_a.append(jnp.ones((1, d_model), jnp.float32))
        ln1_b.append(jnp.zeros((1, d_model), jnp.float32))

    stack = lambda xs: jnp.stack(xs, axis=0)
    return {
        "ln0_a": stack(ln0_a), "ln0_b": stack(ln0_b),
        "ln1_a": stack(ln1_a), "ln1_b": stack(ln1_b),
        "wqkv": stack(wqkv), "bqkv": stack(bqkv),
        "wo": stack(wo), "bo": stack(bo),
        "w1": stack(w1), "b1": stack(b1),
        "w2": stack(w2), "b2": stack(b2),
        "norm_a": jnp.ones((1, d_model), jnp.float32),
        "norm_b": jnp.zeros((1, d_model), jnp.float32),
    }


# ----------------------------- main -----------------------------

if __name__ == "__main__":
    n_layers, d_model, d_ff, h = 2, 32, 64, 4
    B, S = 2, 8

    key = jax.random.PRNGKey(0)
    kp, kx = jax.random.split(key)
    params = init_params(kp, n_layers, d_model, d_ff)

    x = jax.random.normal(kx, (B, S, d_model), jnp.float32)
    # padding-style source mask: batch 0 fully valid, batch 1 has 6 valid tokens
    lengths = jnp.array([S, 6], jnp.int32)
    mask = (jnp.arange(S)[None, None, :] < lengths[:, None, None]).astype(jnp.int32)  # (B,1,S)

    fwd = jax.jit(partial(encoder_forward, h=h))
    out = fwd(params, x, mask)
    jax.block_until_ready(out)

    assert out.shape == (B, S, d_model)
    assert bool(jnp.all(jnp.isfinite(out)))

    ref = encoder_reference(params, x, mask, h=h)
    max_err = float(jnp.max(jnp.abs(out - ref)))
    assert max_err < 0.1, f"mismatch vs reference: {max_err}"

    print("KERNEL_OK")
</pallas_src>

<mosaic_0001>
module attributes {stable_mosaic.version = 11 : i64} {
  func.func @_encoder_stack_kernel(%arg0: i32, %arg1: i32, %arg2: memref<1x8x32xf32, #tpu.memory_space<vmem>>, %arg3: memref<1x8x8xf32, #tpu.memory_space<vmem>>, %arg4: memref<1x1x32xf32, #tpu.memory_space<vmem>>, %arg5: memref<1x1x32xf32, #tpu.memory_space<vmem>>, %arg6: memref<1x32x96xf32, #tpu.memory_space<vmem>>, %arg7: memref<1x1x96xf32, #tpu.memory_space<vmem>>, %arg8: memref<1x32x32xf32, #tpu.memory_space<vmem>>, %arg9: memref<1x1x32xf32, #tpu.memory_space<vmem>>, %arg10: memref<1x1x32xf32, #tpu.memory_space<vmem>>, %arg11: memref<1x1x32xf32, #tpu.memory_space<vmem>>, %arg12: memref<1x32x64xf32, #tpu.memory_space<vmem>>, %arg13: memref<1x1x64xf32, #tpu.memory_space<vmem>>, %arg14: memref<1x64x32xf32, #tpu.memory_space<vmem>>, %arg15: memref<1x1x32xf32, #tpu.memory_space<vmem>>, %arg16: memref<1x32xf32, #tpu.memory_space<vmem>>, %arg17: memref<1x32xf32, #tpu.memory_space<vmem>>, %arg18: memref<1x8x32xf32, #tpu.memory_space<vmem>>) attributes {dimension_semantics = [#tpu.dimension_semantics<parallel>, #tpu.dimension_semantics<arbitrary>], iteration_bounds = array<i64: 2, 2>, scalar_prefetch = 0 : i64, scratch_operands = 0 : i64, tpu.core_type = #tpu.core_type<tc>, window_params = [{transform_indices = @transform_0, window_bounds = array<i64: 1, 8, 32>}, {transform_indices = @transform_1, window_bounds = array<i64: 1, 8, 8>}, {transform_indices = @transform_2, window_bounds = array<i64: 1, 1, 32>}, {transform_indices = @transform_3, window_bounds = array<i64: 1, 1, 32>}, {transform_indices = @transform_4, window_bounds = array<i64: 1, 32, 96>}, {transform_indices = @transform_5, window_bounds = array<i64: 1, 1, 96>}, {transform_indices = @transform_6, window_bounds = array<i64: 1, 32, 32>}, {transform_indices = @transform_7, window_bounds = array<i64: 1, 1, 32>}, {transform_indices = @transform_8, window_bounds = array<i64: 1, 1, 32>}, {transform_indices = @transform_9, window_bounds = array<i64: 1, 1, 32>}, {transform_indices = @transform_10, window_bounds = array<i64: 1, 32, 64>}, {transform_indices = @transform_11, window_bounds = array<i64: 1, 1, 64>}, {transform_indices = @transform_12, window_bounds = array<i64: 1, 64, 32>}, {transform_indices = @transform_13, window_bounds = array<i64: 1, 1, 32>}, {pipeline_mode = #tpu.pipeline_mode<synchronous>, transform_indices = @transform_14, window_bounds = array<i64: 1, 32>}, {pipeline_mode = #tpu.pipeline_mode<synchronous>, transform_indices = @transform_15, window_bounds = array<i64: 1, 32>}, {transform_indices = @transform_16, window_bounds = array<i64: 1, 8, 32>}]} {
    %c0_i32 = arith.constant 0 : i32
    %0 = arith.cmpi eq, %arg1, %c0_i32 : i32
    %1 = arith.extui %0 : i1 to i32
    %c0_i32_0 = arith.constant 0 : i32
    %2 = arith.cmpi ne, %1, %c0_i32_0 : i32
    scf.if %2 {
      %c0_79 = arith.constant 0 : index
      %c0_80 = arith.constant 0 : index
      %c0_81 = arith.constant 0 : index
      %168 = vector.load %arg2[%c0_79, %c0_80, %c0_81] : memref<1x8x32xf32, #tpu.memory_space<vmem>>, vector<1x8x32xf32>
      %c0_82 = arith.constant 0 : index
      %c0_83 = arith.constant 0 : index
      %c0_84 = arith.constant 0 : index
      %169 = vector.load %arg18[%c0_82, %c0_83, %c0_84] : memref<1x8x32xf32, #tpu.memory_space<vmem>>, vector<1x8x32xf32>
      tpu.vector_store %arg18[%c0_82, %c0_83, %c0_84], %168 {strides = array<i32>} : memref<1x8x32xf32, #tpu.memory_space<vmem>>, vector<1x8x32xf32>,
    } else {
    }
    %c0 = arith.constant 0 : index
    %c0_1 = arith.constant 0 : index
    %c0_2 = arith.constant 0 : index
    %3 = vector.load %arg18[%c0, %c0_1, %c0_2] : memref<1x8x32xf32, #tpu.memory_space<vmem>>, vector<1x8x32xf32>
    %4 = vector.shape_cast %3 : vector<1x8x32xf32> to vector<8x32xf32>
    %c0_3 = arith.constant 0 : index
    %c0_4 = arith.constant 0 : index
    %c0_5 = arith.constant 0 : index
    %5 = vector.load %arg3[%c0_3, %c0_4, %c0_5] : memref<1x8x8xf32, #tpu.memory_space<vmem>>, vector<1x8x8xf32>
    %6 = vector.shape_cast %5 : vector<1x8x8xf32> to vector<8x8xf32>
    %c0_6 = arith.constant 0 : index
    %c0_7 = arith.constant 0 : index
    %c0_8 = arith.constant 0 : index
    %7 = vector.load %arg4[%c0_6, %c0_7, %c0_8] : memref<1x1x32xf32, #tpu.memory_space<vmem>>, vector<1x1x32xf32>
    %8 = vector.shape_cast %7 : vector<1x1x32xf32> to vector<1x32xf32>
    %c0_9 = arith.constant 0 : index
    %c0_10 = arith.constant 0 : index
    %c0_11 = arith.constant 0 : index
    %9 = vector.load %arg5[%c0_9, %c0_10, %c0_11] : memref<1x1x32xf32, #tpu.memory_space<vmem>>, vector<1x1x32xf32>
    %10 = vector.shape_cast %9 : vector<1x1x32xf32> to vector<1x32xf32>
    %cst = arith.constant dense<0.000000e+00> : vector<8xf32>
    %11 = vector.multi_reduction <add>, %4, %cst [1] : vector<8x32xf32> to vector<8xf32>
    %12 = vector.shape_cast %11 : vector<8xf32> to vector<8x1xf32>
    %cst_12 = arith.constant 3.200000e+01 : f32
    %13 = vector.broadcast %cst_12 : f32 to vector<8x1xf32>
    %14 = arith.divf %12, %13 : vector<8x1xf32>
    %15 = vector.broadcast %14 : vector<8x1xf32> to vector<8x32xf32>
    %16 = arith.subf %4, %15 : vector<8x32xf32>
    %17 = arith.mulf %16, %16 : vector<8x32xf32>
    %cst_13 = arith.constant dense<0.000000e+00> : vector<8xf32>
    %18 = vector.multi_reduction <add>, %17, %cst_13 [1] : vector<8x32xf32> to vector<8xf32>
    %19 = vector.shape_cast %18 : vector<8xf32> to vector<8x1xf32>
    %cst_14 = arith.constant 0.0322580636 : f32
    %20 = vector.broadcast %cst_14 : f32 to vector<8x1xf32>
    %21 = arith.mulf %19, %20 : vector<8x1xf32>
    %22 = math.sqrt %21 : vector<8x1xf32>
    %23 = vector.broadcast %8 : vector<1x32xf32> to vector<8x32xf32>
    %24 = arith.mulf %23, %16 : vector<8x32xf32>
    %cst_15 = arith.constant 9.99999997E-7 : f32
    %25 = vector.broadcast %cst_15 : f32 to vector<8x1xf32>
    %26 = arith.addf %22, %25 : vector<8x1xf32>
    %27 = tpu.reciprocal %26 {approx = true} : vector<8x1xf32> -> vector<8x1xf32>
    %28 = vector.broadcast %27 : vector<8x1xf32> to vector<8x32xf32>
    %29 = arith.mulf %24, %28 : vector<8x32xf32>
    %30 = vector.broadcast %10 : vector<1x32xf32> to vector<8x32xf32>
    %31 = arith.addf %29, %30 : vector<8x32xf32>
    %c0_16 = arith.constant 0 : index
    %c0_17 = arith.constant 0 : index
    %c0_18 = arith.constant 0 : index
    %32 = vector.load %arg6[%c0_16, %c0_17, %c0_18] : memref<1x32x96xf32, #tpu.memory_space<vmem>>, vector<1x32x96xf32>
    %33 = vector.shape_cast %32 : vector<1x32x96xf32> to vector<32x96xf32>
    %cst_19 = arith.constant dense<0.000000e+00> : vector<8x96xf32>
    %34 = tpu.matmul %31, %33, %cst_19 {dimension_numbers = #tpu.dot_dimension_numbers<[1], [0], [0], [1], [0, 0, 1, 1], [], []>} : vector<8x32xf32>, vector<32x96xf32>, vector<8x96xf32> -> vector<8x96xf32>
    %c0_20 = arith.constant 0 : index
    %c0_21 = arith.constant 0 : index
    %c0_22 = arith.constant 0 : index
    %35 = vector.load %arg7[%c0_20, %c0_21, %c0_22] : memref<1x1x96xf32, #tpu.memory_space<vmem>>, vector<1x1x96xf32>
    %36 = vector.shape_cast %35 : vector<1x1x96xf32> to vector<1x96xf32>
    %37 = vector.broadcast %36 : vector<1x96xf32> to vector<8x96xf32>
    %38 = arith.addf %34, %37 : vector<8x96xf32>
    %39 = vector.extract_strided_slice %38 {offsets = [0, 0], sizes = [8, 8], strides = [1, 1]} : vector<8x96xf32> to vector<8x8xf32>
    %40 = vector.extract_strided_slice %38 {offsets = [0, 32], sizes = [8, 8], strides = [1, 1]} : vector<8x96xf32> to vector<8x8xf32>
    %41 = vector.extract_strided_slice %38 {offsets = [0, 64], sizes = [8, 8], strides = [1, 1]} : vector<8x96xf32> to vector<8x8xf32>
    %cst_23 = arith.constant dense<0.000000e+00> : vector<8x8xf32>
    %42 = tpu.matmul %39, %40, %cst_23 {dimension_numbers = #tpu.dot_dimension_numbers<[1], [1], [0], [0], [0, 0, 1, 0], [], []>} : vector<8x8xf32>, vector<8x8xf32>, vector<8x8xf32> -> vector<8x8xf32>
    %cst_24 = arith.constant 0.353553385 : f32
    %43 = vector.broadcast %cst_24 : f32 to vector<8x8xf32>
    %44 = arith.mulf %42, %43 : vector<8x8xf32>
    %45 = arith.addf %44, %6 : vector<8x8xf32>
    %cst_25 = arith.constant dense<0xFF800000> : vector<8xf32>
    %46 = vector.multi_reduction <maximumf>, %45, %cst_25 [1] : vector<8x8xf32> to vector<8xf32>
    %47 = vector.shape_cast %46 : vector<8xf32> to vector<8x1xf32>
    %48 = vector.broadcast %47 : vector<8x1xf32> to vector<8x8xf32>
    %49 = arith.subf %45, %48 : vector<8x8xf32>
    %50 = math.exp %49 : vector<8x8xf32>
    %cst_26 = arith.constant dense<0.000000e+00> : vector<8xf32>
    %51 = vector.multi_reduction <add>, %50, %cst_26 [1] : vector<8x8xf32> to vector<8xf32>
    %52 = vector.shape_cast %51 : vector<8xf32> to vector<8x1xf32>
    %53 = tpu.reciprocal %52 {approx = true} : vector<8x1xf32> -> vector<8x1xf32>
    %54 = vector.broadcast %53 : vector<8x1xf32> to vector<8x8xf32>
    %55 = arith.mulf %50, %54 : vector<8x8xf32>
    %cst_27 = arith.constant dense<0.000000e+00> : vector<8x8xf32>
    %56 = tpu.matmul %55, %41, %cst_27 {dimension_numbers = #tpu.dot_dimension_numbers<[1], [0], [0], [1], [0, 0, 1, 1], [], []>} : vector<8x8xf32>, vector<8x8xf32>, vector<8x8xf32> -> vector<8x8xf32>
    %57 = vector.extract_strided_slice %38 {offsets = [0, 8], sizes = [8, 8], strides = [1, 1]} : vector<8x96xf32> to vector<8x8xf32>
    %58 = vector.extract_strided_slice %38 {offsets = [0, 40], sizes = [8, 8], strides = [1, 1]} : vector<8x96xf32> to vector<8x8xf32>
    %59 = vector.extract_strided_slice %38 {offsets = [0, 72], sizes = [8, 8], strides = [1, 1]} : vector<8x96xf32> to vector<8x8xf32>
    %cst_28 = arith.constant dense<0.000000e+00> : vector<8x8xf32>
    %60 = tpu.matmul %57, %58, %cst_28 {dimension_numbers = #tpu.dot_dimension_numbers<[1], [1], [0], [0], [0, 0, 1, 0], [], []>} : vector<8x8xf32>, vector<8x8xf32>, vector<8x8xf32> -> vector<8x8xf32>
    %cst_29 = arith.constant 0.353553385 : f32
    %61 = vector.broadcast %cst_29 : f32 to vector<8x8xf32>
    %62 = arith.mulf %60, %61 : vector<8x8xf32>
    %63 = arith.addf %62, %6 : vector<8x8xf32>
    %cst_30 = arith.constant dense<0xFF800000> : vector<8xf32>
    %64 = vector.multi_reduction <maximumf>, %63, %cst_30 [1] : vector<8x8xf32> to vector<8xf32>
    %65 = vector.shape_cast %64 : vector<8xf32> to vector<8x1xf32>
    %66 = vector.broadcast %65 : vector<8x1xf32> to vector<8x8xf32>
    %67 = arith.subf %63, %66 : vector<8x8xf32>
    %68 = math.exp %67 : vector<8x8xf32>
    %cst_31 = arith.constant dense<0.000000e+00> : vector<8xf32>
    %69 = vector.multi_reduction <add>, %68, %cst_31 [1] : vector<8x8xf32> to vector<8xf32>
    %70 = vector.shape_cast %69 : vector<8xf32> to vector<8x1xf32>
    %71 = tpu.reciprocal %70 {approx = true} : vector<8x1xf32> -> vector<8x1xf32>
    %72 = vector.broadcast %71 : vector<8x1xf32> to vector<8x8xf32>
    %73 = arith.mulf %68, %72 : vector<8x8xf32>
    %cst_32 = arith.constant dense<0.000000e+00> : vector<8x8xf32>
    %74 = tpu.matmul %73, %59, %cst_32 {dimension_numbers = #tpu.dot_dimension_numbers<[1], [0], [0], [1], [0, 0, 1, 1], [], []>} : vector<8x8xf32>, vector<8x8xf32>, vector<8x8xf32> -> vector<8x8xf32>
    %75 = vector.extract_strided_slice %38 {offsets = [0, 16], sizes = [8, 8], strides = [1, 1]} : vector<8x96xf32> to vector<8x8xf32>
    %76 = vector.extract_strided_slice %38 {offsets = [0, 48], sizes = [8, 8], strides = [1, 1]} : vector<8x96xf32> to vector<8x8xf32>
    %77 = vector.extract_strided_slice %38 {offsets = [0, 80], sizes = [8, 8], strides = [1, 1]} : vector<8x96xf32> to vector<8x8xf32>
    %cst_33 = arith.constant dense<0.000000e+00> : vector<8x8xf32>
    %78 = tpu.matmul %75, %76, %cst_33 {dimension_numbers = #tpu.dot_dimension_numbers<[1], [1], [0], [0], [0, 0, 1, 0], [], []>} : vector<8x8xf32>, vector<8x8xf32>, vector<8x8xf32> -> vector<8x8xf32>
    %cst_34 = arith.constant 0.353553385 : f32
    %79 = vector.broadcast %cst_34 : f32 to vector<8x8xf32>
    %80 = arith.mulf %78, %79 : vector<8x8xf32>
    %81 = arith.addf %80, %6 : vector<8x8xf32>
    %cst_35 = arith.constant dense<0xFF800000> : vector<8xf32>
    %82 = vector.multi_reduction <maximumf>, %81, %cst_35 [1] : vector<8x8xf32> to vector<8xf32>
    %83 = vector.shape_cast %82 : vector<8xf32> to vector<8x1xf32>
    %84 = vector.broadcast %83 : vector<8x1xf32> to vector<8x8xf32>
    %85 = arith.subf %81, %84 : vector<8x8xf32>
    %86 = math.exp %85 : vector<8x8xf32>
    %cst_36 = arith.constant dense<0.000000e+00> : vector<8xf32>
    %87 = vector.multi_reduction <add>, %86, %cst_36 [1] : vector<8x8xf32> to vector<8xf32>
    %88 = vector.shape_cast %87 : vector<8xf32> to vector<8x1xf32>
    %89 = tpu.reciprocal %88 {approx = true} : vector<8x1xf32> -> vector<8x1xf32>
    %90 = vector.broadcast %89 : vector<8x1xf32> to vector<8x8xf32>
    %91 = arith.mulf %86, %90 : vector<8x8xf32>
    %cst_37 = arith.constant dense<0.000000e+00> : vector<8x8xf32>
    %92 = tpu.matmul %91, %77, %cst_37 {dimension_numbers = #tpu.dot_dimension_numbers<[1], [0], [0], [1], [0, 0, 1, 1], [], []>} : vector<8x8xf32>, vector<8x8xf32>, vector<8x8xf32> -> vector<8x8xf32>
    %93 = vector.extract_strided_slice %38 {offsets = [0, 24], sizes = [8, 8], strides = [1, 1]} : vector<8x96xf32> to vector<8x8xf32>
    %94 = vector.extract_strided_slice %38 {offsets = [0, 56], sizes = [8, 8], strides = [1, 1]} : vector<8x96xf32> to vector<8x8xf32>
    %95 = vector.extract_strided_slice %38 {offsets = [0, 88], sizes = [8, 8], strides = [1, 1]} : vector<8x96xf32> to vector<8x8xf32>
    %cst_38 = arith.constant dense<0.000000e+00> : vector<8x8xf32>
    %96 = tpu.matmul %93, %94, %cst_38 {dimension_numbers = #tpu.dot_dimension_numbers<[1], [1], [0], [0], [0, 0, 1, 0], [], []>} : vector<8x8xf32>, vector<8x8xf32>, vector<8x8xf32> -> vector<8x8xf32>
    %cst_39 = arith.constant 0.353553385 : f32
    %97 = vector.broadcast %cst_39 : f32 to vector<8x8xf32>
    %98 = arith.mulf %96, %97 : vector<8x8xf32>
    %99 = arith.addf %98, %6 : vector<8x8xf32>
    %cst_40 = arith.constant dense<0xFF800000> : vector<8xf32>
    %100 = vector.multi_reduction <maximumf>, %99, %cst_40 [1] : vector<8x8xf32> to vector<8xf32>
    %101 = vector.shape_cast %100 : vector<8xf32> to vector<8x1xf32>
    %102 = vector.broadcast %101 : vector<8x1xf32> to vector<8x8xf32>
    %103 = arith.subf %99, %102 : vector<8x8xf32>
    %104 = math.exp %103 : vector<8x8xf32>
    %cst_41 = arith.constant dense<0.000000e+00> : vector<8xf32>
    %105 = vector.multi_reduction <add>, %104, %cst_41 [1] : vector<8x8xf32> to vector<8xf32>
    %106 = vector.shape_cast %105 : vector<8xf32> to vector<8x1xf32>
    %107 = tpu.reciprocal %106 {approx = true} : vector<8x1xf32> -> vector<8x1xf32>
    %108 = vector.broadcast %107 : vector<8x1xf32> to vector<8x8xf32>
    %109 = arith.mulf %104, %108 : vector<8x8xf32>
    %cst_42 = arith.constant dense<0.000000e+00> : vector<8x8xf32>
    %110 = tpu.matmul %109, %95, %cst_42 {dimension_numbers = #tpu.dot_dimension_numbers<[1], [0], [0], [1], [0, 0, 1, 1], [], []>} : vector<8x8xf32>, vector<8x8xf32>, vector<8x8xf32> -> vector<8x8xf32>
    %111 = tpu.concatenate %56, %74, %92, %110 in 1 : vector<8x8xf32>, vector<8x8xf32>, vector<8x8xf32>, vector<8x8xf32> -> vector<8x32xf32>
    %c0_43 = arith.constant 0 : index
    %c0_44 = arith.constant 0 : index
    %c0_45 = arith.constant 0 : index
    %112 = vector.load %arg8[%c0_43, %c0_44, %c0_45] : memref<1x32x32xf32, #tpu.memory_space<vmem>>, vector<1x32x32xf32>
    %113 = vector.shape_cast %112 : vector<1x32x32xf32> to vector<32x32xf32>
    %cst_46 = arith.constant dense<0.000000e+00> : vector<8x32xf32>
    %114 = tpu.matmul %111, %113, %cst_46 {dimension_numbers = #tpu.dot_dimension_numbers<[1], [0], [0], [1], [0, 0, 1, 1], [], []>} : vector<8x32xf32>, vector<32x32xf32>, vector<8x32xf32> -> vector<8x32xf32>
    %115 = arith.addf %4, %114 : vector<8x32xf32>
    %c0_47 = arith.constant 0 : index
    %c0_48 = arith.constant 0 : index
    %c0_49 = arith.constant 0 : index
    %116 = vector.load %arg9[%c0_47, %c0_48, %c0_49] : memref<1x1x32xf32, #tpu.memory_space<vmem>>, vector<1x1x32xf32>
    %117 = vector.shape_cast %116 : vector<1x1x32xf32> to vector<1x32xf32>
    %118 = vector.broadcast %117 : vector<1x32xf32> to vector<8x32xf32>
    %119 = arith.addf %115, %118 : vector<8x32xf32>
    %c0_50 = arith.constant 0 : index
    %c0_51 = arith.constant 0 : index
    %c0_52 = arith.constant 0 : index
    %120 = vector.load %arg10[%c0_50, %c0_51, %c0_52] : memref<1x1x32xf32, #tpu.memory_space<vmem>>, vector<1x1x32xf32>
    %121 = vector.shape_cast %120 : vector<1x1x32xf32> to vector<1x32xf32>
    %c0_53 = arith.constant 0 : index
    %c0_54 = arith.constant 0 : index
    %c0_55 = arith.constant 0 : index
    %122 = vector.load %arg11[%c0_53, %c0_54, %c0_55] : memref<1x1x32xf32, #tpu.memory_space<vmem>>, vector<1x1x32xf32>
    %123 = vector.shape_cast %122 : vector<1x1x32xf32> to vector<1x32xf32>
    %cst_56 = arith.constant dense<0.000000e+00> : vector<8xf32>
    %124 = vector.multi_reduction <add>, %119, %cst_56 [1] : vector<8x32xf32> to vector<8xf32>
    %125 = vector.shape_cast %124 : vector<8xf32> to vector<8x1xf32>
    %cst_57 = arith.constant 3.200000e+01 : f32
    %126 = vector.broadcast %cst_57 : f32 to vector<8x1xf32>
    %127 = arith.divf %125, %126 : vector<8x1xf32>
    %128 = vector.broadcast %127 : vector<8x1xf32> to vector<8x32xf32>
    %129 = arith.subf %119, %128 : vector<8x32xf32>
    %130 = arith.mulf %129, %129 : vector<8x32xf32>
    %cst_58 = arith.constant dense<0.000000e+00> : vector<8xf32>
    %131 = vector.multi_reduction <add>, %130, %cst_58 [1] : vector<8x32xf32> to vector<8xf32>
    %132 = vector.shape_cast %131 : vector<8xf32> to vector<8x1xf32>
    %cst_59 = arith.constant 0.0322580636 : f32
    %133 = vector.broadcast %cst_59 : f32 to vector<8x1xf32>
    %134 = arith.mulf %132, %133 : vector<8x1xf32>
    %135 = math.sqrt %134 : vector<8x1xf32>
    %136 = vector.broadcast %121 : vector<1x32xf32> to vector<8x32xf32>
    %137 = arith.mulf %136, %129 : vector<8x32xf32>
    %cst_60 = arith.constant 9.99999997E-7 : f32
    %138 = vector.broadcast %cst_60 : f32 to vector<8x1xf32>
    %139 = arith.addf %135, %138 : vector<8x1xf32>
    %140 = tpu.reciprocal %139 {approx = true} : vector<8x1xf32> -> vector<8x1xf32>
    %141 = vector.broadcast %140 : vector<8x1xf32> to vector<8x32xf32>
    %142 = arith.mulf %137, %141 : vector<8x32xf32>
    %143 = vector.broadcast %123 : vector<1x32xf32> to vector<8x32xf32>
    %144 = arith.addf %142, %143 : vector<8x32xf32>
    %c0_61 = arith.constant 0 : index
    %c0_62 = arith.constant 0 : index
    %c0_63 = arith.constant 0 : index
    %145 = vector.load %arg12[%c0_61, %c0_62, %c0_63] : memref<1x32x64xf32, #tpu.memory_space<vmem>>, vector<1x32x64xf32>
    %146 = vector.shape_cast %145 : vector<1x32x64xf32> to vector<32x64xf32>
    %cst_64 = arith.constant dense<0.000000e+00> : vector<8x64xf32>
    %147 = tpu.matmul %144, %146, %cst_64 {dimension_numbers = #tpu.dot_dimension_numbers<[1], [0], [0], [1], [0, 0, 1, 1], [], []>} : vector<8x32xf32>, vector<32x64xf32>, vector<8x64xf32> -> vector<8x64xf32>
    %c0_65 = arith.constant 0 : index
    %c0_66 = arith.constant 0 : index
    %c0_67 = arith.constant 0 : index
    %148 = vector.load %arg13[%c0_65, %c0_66, %c0_67] : memref<1x1x64xf32, #tpu.memory_space<vmem>>, vector<1x1x64xf32>
    %149 = vector.shape_cast %148 : vector<1x1x64xf32> to vector<1x64xf32>
    %150 = vector.broadcast %149 : vector<1x64xf32> to vector<8x64xf32>
    %151 = arith.addf %147, %150 : vector<8x64xf32>
    %cst_68 = arith.constant 0.000000e+00 : f32
    %152 = vector.broadcast %cst_68 : f32 to vector<8x64xf32>
    %153 = arith.maximumf %151, %152 : vector<8x64xf32>
    %c0_69 = arith.constant 0 : index
    %c0_70 = arith.constant 0 : index
    %c0_71 = arith.constant 0 : index
    %154 = vector.load %arg14[%c0_69, %c0_70, %c0_71] : memref<1x64x32xf32, #tpu.memory_space<vmem>>, vector<1x64x32xf32>
    %155 = vector.shape_cast %154 : vector<1x64x32xf32> to vector<64x32xf32>
    %cst_72 = arith.constant dense<0.000000e+00> : vector<8x32xf32>
    %156 = tpu.matmul %153, %155, %cst_72 {dimension_numbers = #tpu.dot_dimension_numbers<[1], [0], [0], [1], [0, 0, 1, 1], [], []>} : vector<8x64xf32>, vector<64x32xf32>, vector<8x32xf32> -> vector<8x32xf32>
    %157 = arith.addf %119, %156 : vector<8x32xf32>
    %c0_73 = arith.constant 0 : index
    %c0_74 = arith.constant 0 : index
    %c0_75 = arith.constant 0 : index
    %158 = vector.load %arg15[%c0_73, %c0_74, %c0_75] : memref<1x1x32xf32, #tpu.memory_space<vmem>>, vector<1x1x32xf32>
    %159 = vector.shape_cast %158 : vector<1x1x32xf32> to vector<1x32xf32>
    %160 = vector.broadcast %159 : vector<1x32xf32> to vector<8x32xf32>
    %161 = arith.addf %157, %160 : vector<8x32xf32>
    %c1_i32 = arith.constant 1 : i32
    %162 = arith.cmpi slt, %arg1, %c1_i32 : i32
    %163 = arith.extui %162 : i1 to i32
    %c0_i32_76 = arith.constant 0 : i32
    %164 = arith.cmpi ne, %163, %c0_i32_76 : i32
    scf.if %164 {
      %c0_79 = arith.constant 0 : index
      %c0_80 = arith.constant 0 : index
      %c0_81 = arith.constant 0 : index
      %168 = vector.load %arg18[%c0_79, %c0_80, %c0_81] : memref<1x8x32xf32, #tpu.memory_space<vmem>>, vector<1x8x32xf32>
      %169 = vector.shape_cast %168 : vector<1x8x32xf32> to vector<8x32xf32>
      %170 = vector.shape_cast %161 : vector<8x32xf32> to vector<1x8x32xf32>
      tpu.vector_store %arg18[%c0_79, %c0_80, %c0_81], %170 {strides = array<i32>} : memref<1x8x32xf32, #tpu.memory_space<vmem>>, vector<1x8x32xf32>,
    } else {
    }
    %c1_i32_77 = arith.constant 1 : i32
    %165 = arith.cmpi eq, %arg1, %c1_i32_77 : i32
    %166 = arith.extui %165 : i1 to i32
    %c0_i32_78 = arith.constant 0 : i32
    %167 = arith.cmpi ne, %166, %c0_i32_78 : i32
    scf.if %167 {
      %c0_79 = arith.constant 0 : index
      %c0_80 = arith.constant 0 : index
      %168 = vector.load %arg16[%c0_79, %c0_80] : memref<1x32xf32, #tpu.memory_space<vmem>>, vector<1x32xf32>
      %c0_81 = arith.constant 0 : index
      %c0_82 = arith.constant 0 : index
      %169 = vector.load %arg17[%c0_81, %c0_82] : memref<1x32xf32, #tpu.memory_space<vmem>>, vector<1x32xf32>
      %cst_83 = arith.constant dense<0.000000e+00> : vector<8xf32>
      %170 = vector.multi_reduction <add>, %161, %cst_83 [1] : vector<8x32xf32> to vector<8xf32>
      %171 = vector.shape_cast %170 : vector<8xf32> to vector<8x1xf32>
      %cst_84 = arith.constant 3.200000e+01 : f32
      %172 = vector.broadcast %cst_84 : f32 to vector<8x1xf32>
      %173 = arith.divf %171, %172 : vector<8x1xf32>
      %174 = vector.broadcast %173 : vector<8x1xf32> to vector<8x32xf32>
      %175 = arith.subf %161, %174 : vector<8x32xf32>
      %176 = arith.mulf %175, %175 : vector<8x32xf32>
      %cst_85 = arith.constant dense<0.000000e+00> : vector<8xf32>
      %177 = vector.multi_reduction <add>, %176, %cst_85 [1] : vector<8x32xf32> to vector<8xf32>
      %178 = vector.shape_cast %177 : vector<8xf32> to vector<8x1xf32>
      %cst_86 = arith.constant 0.0322580636 : f32
      %179 = vector.broadcast %cst_86 : f32 to vector<8x1xf32>
      %180 = arith.mulf %178, %179 : vector<8x1xf32>
      %181 = math.sqrt %180 : vector<8x1xf32>
      %182 = vector.broadcast %168 : vector<1x32xf32> to vector<8x32xf32>
      %183 = arith.mulf %182, %175 : vector<8x32xf32>
      %cst_87 = arith.constant 9.99999997E-7 : f32
      %184 = vector.broadcast %cst_87 : f32 to vector<8x1xf32>
      %185 = arith.addf %181, %184 : vector<8x1xf32>
      %186 = tpu.reciprocal %185 {approx = true} : vector<8x1xf32> -> vector<8x1xf32>
      %187 = vector.broadcast %186 : vector<8x1xf32> to vector<8x32xf32>
      %188 = arith.mulf %183, %187 : vector<8x32xf32>
      %189 = vector.broadcast %169 : vector<1x32xf32> to vector<8x32xf32>
      %190 = arith.addf %188, %189 : vector<8x32xf32>
      %c0_88 = arith.constant 0 : index
      %c0_89 = arith.constant 0 : index
      %c0_90 = arith.constant 0 : index
      %191 = vector.load %arg18[%c0_88, %c0_89, %c0_90] : memref<1x8x32xf32, #tpu.memory_space<vmem>>, vector<1x8x32xf32>
      %192 = vector.shape_cast %191 : vector<1x8x32xf32> to vector<8x32xf32>
      %193 = vector.shape_cast %190 : vector<8x32xf32> to vector<1x8x32xf32>
      tpu.vector_store %arg18[%c0_88, %c0_89, %c0_90], %193 {strides = array<i32>} : memref<1x8x32xf32, #tpu.memory_space<vmem>>, vector<1x8x32xf32>,
    } else {
    }
    return
  }
  func.func @transform_0(%arg0: i32, %arg1: i32) -> (i32, i32, i32) {
    %c0_i32 = arith.constant 0 : i32
    %c0_i32_0 = arith.constant 0 : i32
    %c0_i32_1 = arith.constant 0 : i32
    return %arg0, %c0_i32, %c0_i32_0 : i32, i32, i32
  }
  func.func @transform_1(%arg0: i32, %arg1: i32) -> (i32, i32, i32) {
    %c0_i32 = arith.constant 0 : i32
    %c0_i32_0 = arith.constant 0 : i32
    %c0_i32_1 = arith.constant 0 : i32
    return %arg0, %c0_i32, %c0_i32_0 : i32, i32, i32
  }
  func.func @transform_2(%arg0: i32, %arg1: i32) -> (i32, i32, i32) {
    %c0_i32 = arith.constant 0 : i32
    %c0_i32_0 = arith.constant 0 : i32
    %c0_i32_1 = arith.constant 0 : i32
    return %arg1, %c0_i32, %c0_i32_0 : i32, i32, i32
  }
  func.func @transform_3(%arg0: i32, %arg1: i32) -> (i32, i32, i32) {
    %c0_i32 = arith.constant 0 : i32
    %c0_i32_0 = arith.constant 0 : i32
    %c0_i32_1 = arith.constant 0 : i32
    return %arg1, %c0_i32, %c0_i32_0 : i32, i32, i32
  }
  func.func @transform_4(%arg0: i32, %arg1: i32) -> (i32, i32, i32) {
    %c0_i32 = arith.constant 0 : i32
    %c0_i32_0 = arith.constant 0 : i32
    %c0_i32_1 = arith.constant 0 : i32
    return %arg1, %c0_i32, %c0_i32_0 : i32, i32, i32
  }
  func.func @transform_5(%arg0: i32, %arg1: i32) -> (i32, i32, i32) {
    %c0_i32 = arith.constant 0 : i32
    %c0_i32_0 = arith.constant 0 : i32
    %c0_i32_1 = arith.constant 0 : i32
    return %arg1, %c0_i32, %c0_i32_0 : i32, i32, i32
  }
  func.func @transform_6(%arg0: i32, %arg1: i32) -> (i32, i32, i32) {
    %c0_i32 = arith.constant 0 : i32
    %c0_i32_0 = arith.constant 0 : i32
    %c0_i32_1 = arith.constant 0 : i32
    return %arg1, %c0_i32, %c0_i32_0 : i32, i32, i32
  }
  func.func @transform_7(%arg0: i32, %arg1: i32) -> (i32, i32, i32) {
    %c0_i32 = arith.constant 0 : i32
    %c0_i32_0 = arith.constant 0 : i32
    %c0_i32_1 = arith.constant 0 : i32
    return %arg1, %c0_i32, %c0_i32_0 : i32, i32, i32
  }
  func.func @transform_8(%arg0: i32, %arg1: i32) -> (i32, i32, i32) {
    %c0_i32 = arith.constant 0 : i32
    %c0_i32_0 = arith.constant 0 : i32
    %c0_i32_1 = arith.constant 0 : i32
    return %arg1, %c0_i32, %c0_i32_0 : i32, i32, i32
  }
  func.func @transform_9(%arg0: i32, %arg1: i32) -> (i32, i32, i32) {
    %c0_i32 = arith.constant 0 : i32
    %c0_i32_0 = arith.constant 0 : i32
    %c0_i32_1 = arith.constant 0 : i32
    return %arg1, %c0_i32, %c0_i32_0 : i32, i32, i32
  }
  func.func @transform_10(%arg0: i32, %arg1: i32) -> (i32, i32, i32) {
    %c0_i32 = arith.constant 0 : i32
    %c0_i32_0 = arith.constant 0 : i32
    %c0_i32_1 = arith.constant 0 : i32
    return %arg1, %c0_i32, %c0_i32_0 : i32, i32, i32
  }
  func.func @transform_11(%arg0: i32, %arg1: i32) -> (i32, i32, i32) {
    %c0_i32 = arith.constant 0 : i32
    %c0_i32_0 = arith.constant 0 : i32
    %c0_i32_1 = arith.constant 0 : i32
    return %arg1, %c0_i32, %c0_i32_0 : i32, i32, i32
  }
  func.func @transform_12(%arg0: i32, %arg1: i32) -> (i32, i32, i32) {
    %c0_i32 = arith.constant 0 : i32
    %c0_i32_0 = arith.constant 0 : i32
    %c0_i32_1 = arith.constant 0 : i32
    return %arg1, %c0_i32, %c0_i32_0 : i32, i32, i32
  }
  func.func @transform_13(%arg0: i32, %arg1: i32) -> (i32, i32, i32) {
    %c0_i32 = arith.constant 0 : i32
    %c0_i32_0 = arith.constant 0 : i32
    %c0_i32_1 = arith.constant 0 : i32
    return %arg1, %c0_i32, %c0_i32_0 : i32, i32, i32
  }
  func.func @transform_14(%arg0: i32, %arg1: i32) -> (i32, i32) {
    %c0_i32 = arith.constant 0 : i32
    %c0_i32_0 = arith.constant 0 : i32
    %c0_i32_1 = arith.constant 0 : i32
    return %c0_i32, %c0_i32_0 : i32, i32
  }
  func.func @transform_15(%arg0: i32, %arg1: i32) -> (i32, i32) {
    %c0_i32 = arith.constant 0 : i32
    %c0_i32_0 = arith.constant 0 : i32
    %c0_i32_1 = arith.constant 0 : i32
    return %c0_i32, %c0_i32_0 : i32, i32
  }
  func.func @transform_16(%arg0: i32, %arg1: i32) -> (i32, i32, i32) {
    %c0_i32 = arith.constant 0 : i32
    %c0_i32_0 = arith.constant 0 : i32
    %c0_i32_1 = arith.constant 0 : i32
    return %arg0, %c0_i32, %c0_i32_0 : i32, i32, i32
  }
}

</mosaic_0001>

<bundles_post_ra>
// kernel: encoder_forward.1
= control target key start
LH: loop header
LB: loop body
LE: loop exit
PB: predicated region body
PF: predicated region fallthrough
CT: control target
= control target key end

     0   :  { %s2609_s0 = inlined_call_operand.vmem [shape: f32[2,8,32], index: 0, kind: input, shape index: {}]   ;;  %s2610_s1 = inlined_call_operand.vmem [shape: f32[2,8,8], index: 1, kind: input, shape index: {}]   ;;  %s2611_s2 = inlined_call_operand.vmem [shape: f32[2,1,32], index: 2, kind: input, shape index: {}]   ;;  %s2612_s3 = inlined_call_operand.vmem [shape: f32[2,1,32], index: 3, kind: input, shape index: {}]   ;;  %s2613_s4 = inlined_call_operand.vmem [shape: f32[2,32,96], index: 4, kind: input, shape index: {}]   ;;  %s2614_s5 = inlined_call_operand.vmem [shape: f32[2,1,96], index: 5, kind: input, shape index: {}]   ;;  %s2615_s6 = inlined_call_operand.vmem [shape: f32[2,32,32], index: 6, kind: input, shape index: {}]   ;;  %s2616_s7 = inlined_call_operand.hbm [shape: f32[2,1,32], index: 7, kind: input, shape index: {}]   ;;  %s2617_s8 = inlined_call_operand.vmem [shape: f32[2,1,32], index: 8, kind: input, shape index: {}]   ;;  %s2618_s9 = inlined_call_operand.vmem [shape: f32[2,1,32], index: 9, kind: input, shape index: {}]   ;;  %s2619_s10 = inlined_call_operand.vmem [shape: f32[2,32,64], index: 10, kind: input, shape index: {}]   ;;  %s2620_s11 = inlined_call_operand.hbm [shape: f32[2,1,64], index: 11, kind: input, shape index: {}]   ;;  %s2621_s12 = inlined_call_operand.vmem [shape: f32[2,64,32], index: 12, kind: input, shape index: {}]   ;;  %s2622_s13 = inlined_call_operand.hbm [shape: f32[2,1,32], index: 13, kind: input, shape index: {}]   ;;  %s2623_s14 = inlined_call_operand.hbm [shape: f32[1,32], index: 14, kind: input, shape index: {}]   ;;  %s2624_s15 = inlined_call_operand.vmem [shape: f32[1,32], index: 15, kind: input, shape index: {}]   ;;  %s2625_s16 = inlined_call_operand.hbm [shape: f32[2,8,32], index: 16, kind: output, shape index: {}]  }
   0x1   :  { %2642 = sst [smem:[#allocation29_spill]] %s2609_s0 }
   0x2   :  { %2643 = sst [smem:[#allocation30_spill]] %s2610_s1 }
   0x3   :  { %2644 = sst [smem:[#allocation31_spill]] %s2613_s4 }
   0x4   :  { %2645 = sst [smem:[#allocation32_spill]] %s2614_s5 }
   0x5   :  { %2646 = sst [smem:[#allocation33_spill]] %s2615_s6 }
   0x6   :  { %2647 = sst [smem:[#allocation34_spill]] %s2616_s7 }
   0x7   :  { %2648 = sst [smem:[#allocation35_spill]] %s2617_s8 }
   0x8   :  { %2649 = sst [smem:[#allocation36_spill]] %s2618_s9 }
   0x9   :  { %2650 = sst [smem:[#allocation37_spill]] %s2619_s10 }
   0xa   :  { %2651 = sst [smem:[#allocation38_spill]] %s2620_s11 }
   0xb   :  { %2652 = sst [smem:[#allocation39_spill]] %s2621_s12 }
   0xc   :  { %2653 = sst [smem:[#allocation40_spill]] %s2622_s13 }
   0xd   :  { %2654 = sst [smem:[#allocation41_spill]] %s2623_s14 }
   0xe   :  { %2655 = sst [smem:[#allocation42_spill]] %s2624_s15 }
   0xf   :  { %2656 = sst [smem:[#allocation43_spill]] %s2625_s16 }
  0x10   :  { %21 = vsyncpa [#allocation3], 0 }
  0x11   :  { %23 = vsyncpa [#allocation3 + $0x1], 0 }
  0x12   :  { %24 = vsyncpa [#allocation6], 0 }
  0x13   :  { %26 = vsyncpa [#allocation6 + $0x1], 0 }
  0x14   :  { %27 = vsyncpa [#allocation9], 0 }
  0x15   :  { %28 = vsyncpa [#allocation4], 0 }
  0x16   :  { %30 = vsyncpa [#allocation4 + $0x1], 0  ;;  %s2195_s21 = smov 0   ;;  %s2197_s22 = smov 0  }
  0x17   :  { %s2199_s23 = smov 0   ;;  %s2201_s24 = smov 0  }
  0x18   :  { %s2203_s25 = smov 0   ;;  %s2205_s26 = smov 0  }
  0x19   :  { %s2207_s27 = smov 0   ;;  %s2209_s28 = smov 0  }
  0x1a   :  { %s2211_s29 = smov 0   ;;  %s2213_s30 = smov 0  }
  0x1b   :  { %s2215_s0 = smov 0  }
  0x1c LB: > { %2657 = sst [smem:[#allocation15_spill]] %s2052_s21  ;;  %s45_s17 = sadd.s32 1, %s2084_s29  ;;  %s2092_s0 = sphi %s2215_s0, %s36_s0   ;;  %s2088_s30 = sphi %s2213_s30, %s2716_s30   ;;  %s2084_s29 = sphi %s2211_s29, %s2715_s29   ;;  %s2080_s28 = sphi %s2209_s28, %s2714_s28   ;;  %s2076_s27 = sphi %s2207_s27, %s2713_s27   ;;  %s2072_s26 = sphi %s2205_s26, %s2712_s26   ;;  %s2068_s25 = sphi %s2203_s25, %s2711_s25   ;;  %s2064_s24 = sphi %s2201_s24, %s2710_s24   ;;  %s2060_s23 = sphi %s2199_s23, %s2709_s23   ;;  %s2056_s22 = sphi %s2197_s22, %s2708_s22   ;;  %s2052_s21 = sphi %s2195_s21, %s2707_s21  }
  0x1d   : > { %2658 = sst [smem:[#allocation16_spill]] %s2056_s22  ;;  %s48_s18 = sadd.s32 1, %s2088_s30 }
  0x1e   : > { %2659 = sst [smem:[#allocation17_spill]] %s2060_s23  ;;  %p46_p0 = scmp.ge.s32.totalorder %s45_s17, 2 }
  0x1f   : > { %2660 = sst [smem:[#allocation18_spill]] %s2068_s25  ;;  %s237_s19 = sadd.s32 1, %s2072_s26 }
  0x20   : > { %2661 = sst [smem:[#allocation19_spill]] %s2072_s26  ;;  %p244_p1 = scmp.ne.s32.totalorder %s2072_s26, %s2068_s25 }
  0x21   : > { %2662 = sst [smem:[#allocation20_spill]] %s2084_s29  ;;  %p245_p2 = scmp.eq.s32.totalorder %s2092_s0, 0 }
  0x22   : > { %2663 = sst [smem:[#allocation21_spill]] %s2088_s30  ;;  %s2718_s17 = smov (%p46_p0, %s45_s17), 0 }
  0x23   : > { %2664 = sst [smem:[#allocation22_spill]] %s2092_s0  ;;  %s2720_s18 = smov (!%p46_p0, %s48_s18), %s2088_s30 }
  0x24   : > { %2665 = sst [smem:[#allocation23_spill]] %s2718_s17  ;;  %s234_s20 = ssub.s32 %s2084_s29, %s2718_s17 }
  0x25   : > { %p246_p3 = por %p245_p2, %p244_p1  ;;  %p50_p4 = scmp.ge.s32.totalorder %s2720_s18, 2 }
  0x26   : > { %p235_p5 = scmp.eq.s32.totalorder %s234_s20, 0  ;;  %p1695_p6 = scmp.lt.s32.totalorder %s2092_s0, 4 }
  0x27   : > { %s2722_s18 = smov (%p50_p4, %s2720_s18), 0  ;;  %s2268_s15 = sand.u32 1, %s2072_s26  }
  0x28   : > { %2666 = sst [smem:[#allocation24_spill]] %s2722_s18  ;;  %p2270_p7 = pnand %p1695_p6, %p246_p3 }
  0x29   : > { %s2265_s16 = scalar_select %p235_p5, %s2072_s26, %s237_s19  }
  0x2a   : > { %s598_s20 = sand.u32 1, %s2092_s0   ;;  %s2669_s11 = sld [smem:[#allocation38_spill]] }
  0x2b   : > { %2667 = sst [smem:[#allocation25_spill]] %s2265_s16  ;;  %s601_s19 = scalar_lea.vmem [#allocation5], %s2268_s15 }
  0x2c   : > { %s608_s16 = sshll.u32 %s601_s19, 4  ;;  %s2280_s26 = scalar_lea.sflag [#allocation6], %s598_s20  ;;  %s609_s16 = int_to_ptr.vmem [resolvable:$true] %s608_s16 }
  0x2d   : > { %s2286_s6 = sadd.s32 4294967295, %s2092_s0   ;;  %s1620_s10 = sadd.s32 4294967294, %s2092_s0  }
  0x2e   : > { %p250_p8 = scmp.ne.s32.totalorder %s2068_s25, %s2064_s24  ;;  %p251_p9 = scmp.eq.s32.totalorder %s2286_s6, 0 }
  0x2f   : > { %s461_s17 = sadd.s32 1, %s2060_s23  ;;  %p471_p12 = scmp.ne.s32.totalorder %s2060_s23, %s2056_s22 }
  0x30   : > { %s604_s9 = scalar_lea.hbm %s2669_s11, %s2084_s29  ;;  %p2297_p11 = por %p251_p9, %p250_p8 }
  0x31   : > { %s606_s8 = sshll.u32 %s604_s9, 4  ;;  %s458_s9 = ssub.s32 %s2088_s30, %s2722_s18  ;;  %s607_s8 = int_to_ptr.hbm [resolvable:$true] %s606_s8 }
  0x32   : > { %1686 = dma.hbm_to_vmem [thread:$0]  (!%p2270_p7), %s607_s8, 16, %s609_s16, %s2280_s26  }
  0x33   : > { %p459_p10 = scmp.eq.s32.totalorder %s458_s9, 0  ;;  %p472_p13 = scmp.eq.s32.totalorder %s2286_s6, 3 }
  0x34   : > { %p477_p0 = scmp.ne.s32.totalorder %s2056_s22, %s2052_s21  ;;  %p478_p1 = scmp.eq.s32.totalorder %s1620_s10, 3 }
  0x35   : > { %s2304_s8 = scalar_select %p459_p10, %s2060_s23, %s461_s17  }
  0x36   : > { %p1621_p2 = scmp.ge.s32.totalorder %s2092_s0, 1  ;;  %p2310_p3 = por %p472_p13, %p471_p12 }
  0x37   : > { %2671 = sst [smem:[#allocation26_spill]] %s2304_s8  ;;  %p485_p4 = scmp.lt.s32.totalorder %s2092_s0, 5 }
  0x38   : > { %s2672_s16 = scalar_select %p2310_p3, 1, 0 }
  0x39   : > { %p2315_p5 = por %p478_p1, %p477_p0  ;;  %p2319_p6 = pnand %p1621_p2, %p485_p4 }
  0x3a   : > { %2673 = sst [smem:[#allocation27_spill]] %s2672_s16  ;;  %s2094_s11 = smov [#allocation8]  }
  0x3b   : > { %s2674_s24 = scalar_select %p2315_p5, 1, 0 }
  0x3c   : > { %s2677_s14 = sld [smem:[#allocation41_spill]]  ;;  %p1676_p8 = pneg %p2319_p6 }
  0x3d   : > { %2675 = sst [smem:[#allocation28_spill]] %s2674_s24  ;;  %s499_s18 = sshll.u32 %s2094_s11, 4  ;;  %s500_s18 = int_to_ptr.vmem [resolvable:$true] %s499_s18 }
  0x3e   : > { %p1677_p10 = pnand %p1676_p8, %p251_p9  ;;  %s2678_s7 = sld [smem:[#allocation34_spill]] }
  0x3f   : > { %s564_s9 = scalar_lea.vmem [#allocation2], %s2268_s15  ;;  %s2679_s13 = sld [smem:[#allocation40_spill]] }
  0x40   : > { %s571_s17 = sshll.u32 %s564_s9, 4  ;;  %s626_s4 = scalar_lea.vmem [#allocation7], %s2268_s15  ;;  %s572_s17 = int_to_ptr.vmem [resolvable:$true] %s571_s17 }
  0x41   : > { %s633_s5 = sshll.u32 %s626_s4, 4  ;;  %s634_s5 = int_to_ptr.vmem [resolvable:$true] %s633_s5 }
  0x42   : > { %s497_s10 = sshll.u32 %s2677_s14, 4  ;;  %s562_s14 = scalar_lea.sflag [#allocation3], %s2268_s15  ;;  %s498_s10 = int_to_ptr.hbm [resolvable:$true] %s497_s10 }
  0x43   : > { %1679 = dma.hbm_to_vmem [thread:$0]  (!%p1677_p10), %s498_s10, 16, %s500_s18, [#allocation9]  }
  0x44   : > { %s567_s23 = scalar_lea.hbm %s2678_s7, %s2084_s29  ;;  %642 = sbr.rel (%p2319_p6) target bundleno = 2656 (0xa60), region = 84 }
  0x45   : > { %s569_s24 = sshll.u32 %s567_s23, 4  ;;  %s629_s0 = scalar_lea.hbm %s2679_s13, %s2084_s29  ;;  %s570_s24 = int_to_ptr.hbm [resolvable:$true] %s569_s24 }
  0x46   : > { %1683 = dma.hbm_to_vmem [thread:$0]  (!%p2270_p7), %s570_s24, 16, %s572_s17, %s562_s14  }
  0x47   : > { %s631_s16 = sshll.u32 %s629_s0, 4  ;;  %s2349_s23 = sand.u32 (!%p2319_p6), 1, %s2068_s25   ;;  %s632_s16 = int_to_ptr.hbm [resolvable:$true] %s631_s16 }
  0x48   : > { %1689 = dma.hbm_to_vmem [thread:$0]  (!%p2270_p7), %s632_s16, 16, %s634_s5, %s2280_s26  }
  0x49   : > { %s645_s14 = scalar_lea.sflag [#allocation3], %s2349_s23 }
  0x4a   : > { %2035 = dma.done.wait (%p2297_p11), %s645_s14, 16  }
  0x4b   : > { %2037 = vsyncadd (%p2297_p11), %s645_s14, 4294967280  ;;  %s653_s4 = sand.u32 1, %s2286_s6  }
  0x4c   : > { %s654_s5 = scalar_lea.sflag [#allocation6], %s653_s4 }
  0x4d   : > { %2039 = dma.done.wait (%p2297_p11), %s654_s5, 32  }
  0x4e   : > { %2041 = vsyncadd (%p2297_p11), %s654_s5, 4294967264 }
  0x4f   : > { %2043 = dma.done.wait (%p251_p9), [#allocation9], 16  }
  0x50   : > { %2045 = vsyncadd (%p251_p9), [#allocation9], 4294967280  ;;  %s2638_s21 = sand.u32 1, %s2056_s22   ;;  %p770_p7 = scmp.lt.s32.totalorder %s2080_s28, 1 }
  0x51   : > { %s1626_s26 = sshll.u32 %s2638_s21, 3  ;;  %p778_p12 = scmp.lt.s32.totalorder %s2076_s27, 1 }
  0x52   : > { %s771_s0 = scalar_select %p770_p7, %s2080_s28, 1 }
  0x53   : > { %s2375_s18 = scalar_select %p778_p12, %s2076_s27, 1 }
  0x54   : > { %s1627_s6 = sshll.u32 %s771_s0, 3  ;;  %s2680_s16 = sld [smem:[#allocation29_spill]] }
  0x55   : > { %s2681_s1 = sld [smem:[#allocation30_spill]]  ;;  %s1660_s15 = sshll.u32 %s2375_s18, 5 }
  0x56   : > { %s2684_s10 = sld [smem:[#allocation33_spill]]  ;;  %s1663_s19 = sshll.u32 %s2375_s18, 6 }
  0x57   : > { %s2685_s14 = sld [smem:[#allocation35_spill]]  ;;  %s2427_s20 = scalar_lea.vmem [#allocation10], %s1626_s26 }
  0x58   : > { %s2686_s29 = sld [smem:[#allocation36_spill]]  ;;  %p1637_p9 = scmp.ne.s32.totalorder %s2076_s27, 0 }
  0x59   : > { %s2687_s0 = sld [smem:[#allocation37_spill]] }
  0x5a   : > { %s773_s24 = scalar_lea.vmem %s2680_s16, %s1627_s6  ;;  %s2683_s16 = sld [smem:[#allocation31_spill]] }
  0x5b   : > { %s2383_s9 = scalar_lea.vmem %s2681_s1, %s1627_s6  ;;  %s2688_s22 = sld [smem:[#allocation39_spill]] }
  0x5c   : > { %s2406_s1 = scalar_lea.vmem %s2684_s10, %s1660_s15 }
  0x5d   : > { %s799_s4 = scalar_lea.vmem %s2685_s14, %s2375_s18  ;;  %816 = sbr.rel (%p1637_p9) target bundleno = 100 (0x64), region = 104 }
  0x5e   : > { %s802_s25 = scalar_lea.vmem %s2686_s29, %s2375_s18 }
  0x5f   : > { %s2419_s7 = scalar_lea.vmem %s2687_s0, %s1660_s15 }
  0x60   : > { %s2401_s13 = scalar_lea.vmem %s2683_s16, %s1660_s15 }
  0x61   : > { %s2425_s6 = scalar_lea.vmem %s2688_s22, %s1663_s19 }
  0x62   : > { %v817_v0 = vld [vmem:[%s773_s24] sm:$0xff]  ;;  %vm818_vm0 = vcmask 261120  }
  0x63   : > { %819 = vst.msk [vmem:[%s2427_s20] sm:$0xff] %vm818_vm0, %v817_v0 }
  0x64 PF: > { %vm824_vm1 = vcmask 261120   ;;  %v2095_v3 = vmov 32.0   ;;  %v868_v15 = vld [vmem:[%s2401_s13 + $0x18] sm:$0xff]  ;;  %v867_v16 = vld [vmem:[%s2401_s13 + $0x10] sm:$0xff]  ;;  %v866_v17 = vld [vmem:[%s2401_s13 + $0x8] sm:$0xff]  ;;  %s2689_s29 = scalar_lea.vmem %s2611_s2, %s2375_s18  ;;  %s2690_s26 = scalar_lea.vmem %s2612_s3, %s2375_s18  ;;  %vm899_vm5 = vcmask 64512  }
  0x65   : > { %1810 = vrcp.f32 %v2095_v3  ;;  %888 = vmatpush.msra.mxu0 %v868_v15  ;;  %v865_v18 = vld [vmem:[%s2401_s13] sm:$0xff]  ;;  %s2691_s10 = sld [smem:[#allocation32_spill]]  ;;  %s2096_s11 = smov 64   ;;  %vm1177_vm6 = vcmask 130048   ;;  %vm1179_vm7 = vcmask 195584   ;;  %vm1289_vm10 = vcmask 523264  }
  0x66   : > { %v1802_v32 = vld [vmem:[%s2689_s29] ss:$0 sm:$0xff]  ;;  %s2097_s5 = smov 120   ;;  %s2098_s12 = smov 96  }
  0x67   : > { %889 = vmatpush.msra.mxu0 %v867_v16  ;;  %v1803_v34 = vld [vmem:[%s2690_s26] ss:$0 sm:$0xff]  ;;  %s2099_s30 = smov 72   ;;  %s2100_s0 = smov 88  }
  0x68   : > { %v821_v46 = vld [vmem:[%s2383_s9] sm:$0xff]  ;;  %s2101_s19 = smov 56   ;;  %s2102_s8 = smov 80  }
  0x69   : > { %890 = vmatpush.msra.mxu0 %v866_v17  ;;  %s2103_s9 = smov 104   ;;  %s2104_s16 = smov 112  }
  0x6a   : > { %v2432_v1 = vld [vmem:[%s2427_s20] sm:$0xff]  ;;  %s2105_s13 = smov 48   ;;  %s2106_s22 = smov 8  }
  0x6b   : > { %v825_v2 = vsel %vm824_vm1, %v2432_v1, 0.0  ;;  %v1811_v4 = vpop.eup %1810  ;;  %891 = vmatpush.msra.mxu0 %v865_v18  ;;  %s2692_s17 = scalar_lea.vmem %s2691_s10, %s2375_s18  ;;  %s2107_s29 = smov 40  }
  0x6c   : > { %826 = vadd.xlane.f32.xlu0 %v825_v2  ;;  %v829_v5 = vmul.f32 32.0, %v1811_v4  ;;  %vm833_vm2 = vweird.f32 %v1811_v4  ;;  %v1804_v38 = vld [vmem:[%s2692_s17] ss:$0 sm:$0xff]  ;;  %s2108_s15 = smov 16   ;;  %s2109_s21 = smov 24  }
  0x6d   : > { %s2693_s26 = scalar_lea.vmem [#allocation2], %s2349_s23  ;;  %p1654_p11 = scmp.ge.s32.totalorder %s2076_s27, 1 }
  0x6e   : > { %v830_v6 = vsub.f32 1.0, %v829_v5 }
  0x70   : > { %v831_v7 = vmul.f32 %v1811_v4, %v830_v6 }
  0x72   : > { %v832_v8 = vadd.f32 %v1811_v4, %v831_v7 }
  0x74   : > { %v2436_v9 = vsel %vm833_vm2, %v1811_v4, %v832_v8 }
  0xdf   : > { %v827_v10 = vpop.xlane.xlu0 %826 }
  0xe0   : > { %v835_v11 = vmul.f32 %v2436_v9, %v827_v10 }
  0xe2   : > { %v836_v12 = vsub.f32 %v2432_v1, %v835_v11 }
  0xe4   : > { %v837_v13 = vmul.f32 %v836_v12, %v836_v12  ;;  %v857_v33 = vmul.f32 %v1802_v32, %v836_v12 }
  0xe6   : > { %v838_v14 = vsel %vm824_vm1, %v837_v13, 0.0 }
  0xe7   : > { %839 = vadd.xlane.f32.xlu0 %v838_v14 }
 0x15a   : > { %v840_v19 = vpop.xlane.xlu0 %839 }
 0x15b   : > { %v841_v20 = vmul.f32 0.032258064, %v840_v19 }
 0x15d   : > { %1812 = vrsqrt.f32 %v841_v20  ;;  %vm849_vm3 = vcmp.eq.f32.partialorder %v841_v20, inf  ;;  %v852_v28 = vand.u32 2147483648, %v841_v20  ;;  %vm851_vm4 = vcmp.eq.f32.partialorder %v841_v20, 0.0 }
 0x163   : > { %v1813_v21 = vpop.eup %1812 }
 0x164   : > { %v843_v22 = vmul.f32 %v1813_v21, %v841_v20 }
 0x166   : > { %v844_v23 = vmul.f32 %v1813_v21, %v843_v22 }
 0x168   : > { %v845_v24 = vmul.f32 0.5, %v844_v23 }
 0x16a   : > { %v846_v25 = vsub.f32 1.5, %v845_v24 }
 0x16c   : > { %v847_v26 = vmul.f32 %v1813_v21, %v846_v25 }
 0x16e   : > { %v848_v27 = vmul.f32 %v847_v26, %v841_v20 }
 0x170   : > { %v850_v29 = vsel %vm849_vm3, %v841_v20, %v848_v27 }
 0x171   : > { %v853_v30 = vsel %vm851_vm4, %v852_v28, %v850_v29 }
 0x172   : > { %v858_v31 = vadd.f32 1e-06, %v853_v30 }
 0x174   : > { %1814 = vrcp.f32 %v858_v31 }
 0x17a   : > { %v1815_v35 = vpop.eup %1814 }
 0x17b   : > { %v860_v36 = vmul.f32 %v1815_v35, %v857_v33 }
 0x17d   : > { %v864_v37 = vadd.f32 %v1803_v34, %v860_v36 }
 0x17f   : > { %1638 = vmatmul.msk.f32.vlgmr.msra.gmra.mxu0 %vm824_vm1, %v864_v37 }
 0x1fc   : > { %v893_v39 = vpop.f32.mrf.mxu0 }
 0x1fd   : > { %v2461_v40 = vadd.f32 %v1804_v38, %v893_v39 }
 0x1ff   : > { %937 = vrot.lane.b32.xlu0 %v2461_v40, %s2096_s11  ;;  %963 = vrot.lane.b32.xlu2 %v2461_v40, %s2097_s5  ;;  %s2696_s11 = scalar_lea.vmem [#allocation5], %s2349_s23 }
 0x200   : > { %897 = vrot.lane.b32.xlu1 %v2461_v40, %s2098_s12 }
 0x207   : > { %1099 = vrot.lane.b32.xlu0 %v2461_v40, %s2099_s30 }
 0x208   : > { %965 = vrot.lane.b32.xlu1 %v2461_v40, %s2100_s0 }
 0x259   : > { %v964_v44 = vpop.permute.xlu2 %963 }
 0x271   : > { %v938_v41 = vpop.permute.xlu0 %937 }
 0x272   : > { %v898_v42 = vpop.permute.xlu1 %897  ;;  %958 = vmatpush.msra.mxu2 %v938_v41 }
 0x273   : > { %1639 = vmatpush.xpose.msk.msra.mxu1 %vm899_vm5, %v898_v42 }
 0x276   : > { %1640 = vmatmul.msk.f32.vlgmr.msra.gmra.mxu1 %vm899_vm5, %v2461_v40 }
 0x279   : > { %v1100_v57 = vpop.permute.xlu0 %1099 }
 0x27a   : > { %v966_v43 = vpop.permute.xlu1 %965 }
 0x27b   : > { %1642 = vmatpush.xpose.msk.msra.mxu3 %vm899_vm5, %v966_v43  ;;  %v1184_v43 = vld [vmem:[%s2406_s1 + $0x18] sm:$0xff] }
 0x27e   : > { %1643 = vmatmul.msk.f32.vlgmr.msra.gmra.mxu3 %vm899_vm5, %v964_v44  ;;  %v1183_v44 = vld [vmem:[%s2406_s1 + $0x10] sm:$0xff] }
 0x2f3   : > { %v921_v45 = vpop.f32.mrf.mxu1 }
 0x2f4   : > { %v924_v47 = vmul.f32 0.35355338, %v921_v45  ;;  %v1182_v45 = vld [vmem:[%s2406_s1 + $0x8] sm:$0xff] }
 0x2f6   : > { %v925_v48 = vadd.f32 %v924_v47, %v821_v46 }
 0x2f8   : > { %v926_v49 = vsel %vm899_vm5, %v925_v48, -inf }
 0x2f9   : > { %927 = vmax.xlane.f32.xlu2 %v926_v49 }
 0x301   : > { %v988_v50 = vpop.f32.mrf.mxu3 }
 0x302   : > { %v991_v51 = vmul.f32 0.35355338, %v988_v50 }
 0x304   : > { %v992_v52 = vadd.f32 %v991_v51, %v821_v46 }
 0x306   : > { %v993_v53 = vsel %vm899_vm5, %v992_v52, -inf }
 0x307   : > { %994 = vmax.xlane.f32.xlu0 %v993_v53  ;;  %v1805_v53 = vld [vmem:[%s2693_s26] ss:$0 sm:$0xff] }
 0x311   : > { %1004 = vrot.lane.b32.xlu2 %v2461_v40, %s2101_s19 }
 0x31b   : > { %1032 = vrot.lane.b32.xlu0 %v2461_v40, %s2102_s8 }
 0x36c   : > { %v928_v54 = vpop.xlane.xlu2 %927 }
 0x36d   : > { %v929_v55 = vsub.f32 %v925_v48, %v928_v54 }
 0x36f   : > { %v930_v56 = vmul.f32 1.442695, %v929_v55 }
 0x371   : > { %1816 = vpow2.f32 %v930_v56 }
 0x374   : > { %v1005_v58 = vpop.permute.xlu2 %1004 }
 0x375   : > { %1025 = vmatpush.msrb.mxu2 %v1005_v58 }
 0x377   : > { %v1817_v59 = vpop.eup %1816 }
 0x378   : > { %v932_v60 = vsel %vm899_vm5, %v1817_v59, 0.0 }
 0x379   : > { %933 = vadd.xlane.f32.xlu1 %v932_v60 }
 0x37a   : > { %v995_v61 = vpop.xlane.xlu0 %994 }
 0x37b   : > { %v996_v62 = vsub.f32 %v992_v52, %v995_v61 }
 0x37d   : > { %v997_v63 = vmul.f32 1.442695, %v996_v62 }
 0x37f   : > { %1818 = vpow2.f32 %v997_v63  ;;  %v1252_v63 = vld [vmem:[%s2419_s7 + $0x18] sm:$0xff] }
 0x385   : > { %v1819_v0 = vpop.eup %1818 }
 0x386   : > { %v999_v2 = vsel %vm899_vm5, %v1819_v0, 0.0 }
 0x387   : > { %1000 = vadd.xlane.f32.xlu0 %v999_v2  ;;  %v1249_v2 = vld [vmem:[%s2419_s7] sm:$0xff] }
 0x38d   : > { %v1033_v3 = vpop.permute.xlu0 %1032 }
 0x38e   : > { %1645 = vmatpush.xpose.msk.msrb.mxu1 %vm899_vm5, %v1033_v3 }
 0x392   : > { %1097 = vrot.lane.b32.xlu1 %v2461_v40, %s2103_s9  ;;  %1200 = vmatpush.msra.mxu1 %v1184_v43 }
 0x394   : > { %1201 = vmatpush.msra.mxu1 %v1183_v44 }
 0x396   : > { %1202 = vmatpush.msra.mxu1 %v1182_v45 }
 0x39b   : > { %1030 = vrot.lane.b32.xlu0 %v2461_v40, %s2104_s16 }
 0x3ec   : > { %v934_v4 = vpop.xlane.xlu1 %933 }
 0x3ed   : > { %1820 = vrcp.f32 %v934_v4 }
 0x3f3   : > { %v1821_v5 = vpop.eup %1820 }
 0x3f4   : > { %v936_v6 = vmul.f32 %v1821_v5, %v1817_v59  ;;  %v1288_v5 = vld [vmem:[%s2425_s6 + $0x38] sm:$0xff] }
 0x3f5   : > { %1301 = vmatpush.msrb.mxu0 %v1288_v5 }
 0x3f6   : > { %1641 = vmatmul.msk.f32.vlgmr.msra.gmra.mxu2 %vm899_vm5, %v936_v6  ;;  %v1287_v6 = vld [vmem:[%s2425_s6 + $0x30] sm:$0xff] }
 0x3f7   : > { %1648 = vmatpush.xpose.msk.msra.mxu2 %vm899_vm5, %v1100_v57  ;;  %1302 = vmatpush.msrb.mxu0 %v1287_v6 }
 0x3fa   : > { %v1001_v7 = vpop.xlane.xlu0 %1000 }
 0x3fb   : > { %1822 = vrcp.f32 %v1001_v7  ;;  %v1286_v7 = vld [vmem:[%s2425_s6 + $0x28] sm:$0xff] }
 0x3fc   : > { %1303 = vmatpush.msrb.mxu0 %v1286_v7 }
 0x401   : > { %v1823_v8 = vpop.eup %1822 }
 0x402   : > { %v1003_v10 = vmul.f32 %v1823_v8, %v1819_v0  ;;  %v1250_v0 = vld [vmem:[%s2419_s7 + $0x8] sm:$0xff] }
 0x404   : > { %1644 = vmatmul.msk.f32.vlgmr.msrb.gmra.mxu2 %vm899_vm5, %v1003_v10  ;;  %v1098_v11 = vpop.permute.xlu1 %1097  ;;  %v1285_v10 = vld [vmem:[%s2425_s6 + $0x20] sm:$0xff] }
 0x405   : > { %1304 = vmatpush.msrb.mxu0 %v1285_v10 }
 0x40c   : > { %1649 = vmatmul.msk.f32.vlgmr.msra.gmra.mxu2 %vm899_vm5, %v1098_v11 }
 0x40d   : > { %v1031_v12 = vpop.permute.xlu0 %1030 }
 0x40e   : > { %1646 = vmatmul.msk.f32.vlgmr.msrb.gmra.mxu1 %vm899_vm5, %v1031_v12  ;;  %v1284_v12 = vld [vmem:[%s2425_s6 + $0x18] sm:$0xff] }
 0x40f   : > { %1305 = vmatpush.msrb.mxu0 %v1284_v12 }
 0x479   : > { %v2488_v13 = vpop.f32.mrf.mxu2 }
 0x487   : > { %v1027_v14 = vpop.f32.mrf.mxu2 }
 0x48b   : > { %v1055_v15 = vpop.f32.mrf.mxu1 }
 0x48c   : > { %v1058_v16 = vmul.f32 0.35355338, %v1055_v15 }
 0x48e   : > { %v1059_v17 = vadd.f32 %v1058_v16, %v821_v46 }
 0x48f   : > { %v1122_v18 = vpop.f32.mrf.mxu2 }
 0x490   : > { %v1125_v19 = vmul.f32 0.35355338, %v1122_v18  ;;  %v1060_v20 = vsel %vm899_vm5, %v1059_v17, -inf }
 0x491   : > { %1061 = vmax.xlane.f32.xlu2 %v1060_v20 }
 0x492   : > { %v1126_v21 = vadd.f32 %v1125_v19, %v821_v46  ;;  %v1181_v46 = vld [vmem:[%s2406_s1] sm:$0xff] }
 0x493   : > { %1203 = vmatpush.msra.mxu1 %v1181_v46 }
 0x494   : > { %v1127_v22 = vsel %vm899_vm5, %v1126_v21, -inf }
 0x495   : > { %1128 = vmax.xlane.f32.xlu0 %v1127_v22  ;;  %v1806_v22 = vld [vmem:[%s799_s4] ss:$0 sm:$0xff] }
 0x4a9   : > { %1071 = vrot.lane.b32.xlu0 %v2461_v40, %s2105_s13 }
 0x504   : > { %v1062_v23 = vpop.xlane.xlu2 %1061 }
 0x505   : > { %v1063_v24 = vsub.f32 %v1059_v17, %v1062_v23 }
 0x507   : > { %v1064_v25 = vmul.f32 1.442695, %v1063_v24  ;;  %v1807_v24 = vld [vmem:[%s802_s25] ss:$0 sm:$0xff]  ;;  %s2697_s25 = scalar_lea.vmem [#allocation7], %s2349_s23 }
 0x508   : > { %v1129_v26 = vpop.xlane.xlu0 %1128 }
 0x509   : > { %1824 = vpow2.f32 %v1064_v25  ;;  %v1130_v27 = vsub.f32 %v1126_v21, %v1129_v26 }
 0x50b   : > { %v1131_v28 = vmul.f32 1.442695, %v1130_v27 }
 0x50d   : > { %1826 = vpow2.f32 %v1131_v28  ;;  %v1283_v28 = vld [vmem:[%s2425_s6 + $0x10] sm:$0xff] }
 0x50e   : > { %1306 = vmatpush.msrb.mxu0 %v1283_v28 }
 0x50f   : > { %v1825_v29 = vpop.eup %1824 }
 0x510   : > { %v1066_v30 = vsel %vm899_vm5, %v1825_v29, 0.0 }
 0x511   : > { %1067 = vadd.xlane.f32.xlu1 %v1066_v30  ;;  %v1281_v30 = vld [vmem:[%s2425_s6] sm:$0xff] }
 0x513   : > { %v1827_v31 = vpop.eup %1826 }
 0x514   : > { %v1133_v32 = vsel %vm899_vm5, %v1827_v31, 0.0 }
 0x515   : > { %1134 = vadd.xlane.f32.xlu2 %v1133_v32 }
 0x51b   : > { %v1072_v33 = vpop.permute.xlu0 %1071 }
 0x51c   : > { %1092 = vmatpush.msrb.mxu3 %v1072_v33 }
 0x51e   : > { %1272 = vmatpush.msra.mxu3 %v1252_v63 }
 0x52a   : > { %1165 = vrot.lane.b32.xlu1 %v1027_v14, %s2106_s22 }
 0x52d   : > { %1138 = vrot.lane.b32.xlu2 %v2461_v40, %s2107_s29 }
 0x584   : > { %v1068_v34 = vpop.xlane.xlu1 %1067 }
 0x585   : > { %1828 = vrcp.f32 %v1068_v34 }
 0x588   : > { %v1135_v35 = vpop.xlane.xlu2 %1134 }
 0x589   : > { %1830 = vrcp.f32 %v1135_v35  ;;  %v1809_v35 = vld [vmem:[%s2697_s25] ss:$0 sm:$0xff] }
 0x58b   : > { %v1829_v36 = vpop.eup %1828 }
 0x58c   : > { %v1070_v37 = vmul.f32 %v1829_v36, %v1825_v29  ;;  %v1282_v29 = vld [vmem:[%s2425_s6 + $0x8] sm:$0xff] }
 0x58d   : > { %1307 = vmatpush.msrb.mxu0 %v1282_v29 }
 0x58e   : > { %1647 = vmatmul.msk.f32.vlgmr.msrb.gmra.mxu3 %vm899_vm5, %v1070_v37 }
 0x58f   : > { %v1831_v38 = vpop.eup %1830  ;;  %1308 = vmatpush.msrb.mxu0 %v1281_v30 }
 0x590   : > { %v1137_v39 = vmul.f32 %v1831_v38, %v1827_v31  ;;  %v1139_v41 = vpop.permute.xlu2 %1138  ;;  %v1808_v31 = vld [vmem:[%s2696_s11] ss:$0 sm:$0xff] }
 0x591   : > { %1159 = vmatpush.msrb.mxu2 %v1139_v41 }
 0x592   : > { %1650 = vmatmul.msk.f32.vlgmr.msrb.gmra.mxu2 %vm899_vm5, %v1137_v39 }
 0x59c   : > { %v1166_v48 = vpop.permute.xlu1 %1165 }
 0x59d   : > { %v1176_v49 = vsel %vm899_vm5, %v2488_v13, %v1166_v48 }
 0x611   : > { %v1094_v42 = vpop.f32.mrf.mxu3 }
 0x612   : > { %1169 = vrot.lane.b32.xlu0 %v1094_v42, %s2108_s15 }
 0x615   : > { %v1161_v40 = vpop.f32.mrf.mxu2 }
 0x61a   : > { %1173 = vrot.lane.b32.xlu0 %v1161_v40, %s2109_s21 }
 0x684   : > { %v1170_v47 = vpop.permute.xlu0 %1169 }
 0x685   : > { %v1178_v50 = vsel %vm1177_vm6, %v1176_v49, %v1170_v47 }
 0x68c   : > { %v1174_v51 = vpop.permute.xlu0 %1173 }
 0x68d   : > { %v1180_v52 = vsel %vm1179_vm7, %v1178_v50, %v1174_v51 }
 0x68e   : > { %1651 = vmatmul.msk.f32.vlgmr.msra.gmra.mxu1 %vm824_vm1, %v1180_v52 }
 0x70b   : > { %v1205_v54 = vpop.f32.mrf.mxu1 }
 0x70c   : > { %v1208_v55 = vadd.f32 %v1205_v54, %v2432_v1  ;;  %v1251_v1 = vld [vmem:[%s2419_s7 + $0x10] sm:$0xff] }
 0x70d   : > { %1273 = vmatpush.msra.mxu3 %v1251_v1 }
 0x70e   : > { %v2508_v56 = vadd.f32 %v1805_v53, %v1208_v55 }
 0x70f   : > { %1274 = vmatpush.msra.mxu3 %v1250_v0 }
 0x710   : > { %v1216_v57 = vsel %vm824_vm1, %v2508_v56, 0.0 }
 0x711   : > { %1217 = vadd.xlane.f32.xlu2 %v1216_v57  ;;  %1275 = vmatpush.msra.mxu3 %v1249_v2 }
 0x784   : > { %v1218_v58 = vpop.xlane.xlu2 %1217 }
 0x785   : > { %v1219_v59 = vmul.f32 %v1218_v58, %v2436_v9 }
 0x787   : > { %v1220_v60 = vsub.f32 %v2508_v56, %v1219_v59 }
 0x789   : > { %v1221_v61 = vmul.f32 %v1220_v60, %v1220_v60  ;;  %v1241_v23 = vmul.f32 %v1806_v22, %v1220_v60 }
 0x78b   : > { %v1222_v62 = vsel %vm824_vm1, %v1221_v61, 0.0 }
 0x78c   : > { %1223 = vadd.xlane.f32.xlu1 %v1222_v62 }
 0x7ff   : > { %v1224_v3 = vpop.xlane.xlu1 %1223 }
 0x800   : > { %v1225_v4 = vmul.f32 0.032258064, %v1224_v3 }
 0x802   : > { %1832 = vrsqrt.f32 %v1225_v4  ;;  %vm1233_vm8 = vcmp.eq.f32.partialorder %v1225_v4, inf  ;;  %v1236_v18 = vand.u32 2147483648, %v1225_v4  ;;  %vm1235_vm9 = vcmp.eq.f32.partialorder %v1225_v4, 0.0 }
 0x808   : > { %v1833_v8 = vpop.eup %1832 }
 0x809   : > { %v1227_v11 = vmul.f32 %v1833_v8, %v1225_v4 }
 0x80b   : > { %v1228_v13 = vmul.f32 %v1833_v8, %v1227_v11 }
 0x80d   : > { %v1229_v14 = vmul.f32 0.5, %v1228_v13 }
 0x80f   : > { %v1230_v15 = vsub.f32 1.5, %v1229_v14 }
 0x811   : > { %v1231_v16 = vmul.f32 %v1833_v8, %v1230_v15 }
 0x813   : > { %v1232_v17 = vmul.f32 %v1231_v16, %v1225_v4 }
 0x815   : > { %v1234_v19 = vsel %vm1233_vm8, %v1225_v4, %v1232_v17 }
 0x816   : > { %v1237_v20 = vsel %vm1235_vm9, %v1236_v18, %v1234_v19 }
 0x817   : > { %v1242_v21 = vadd.f32 1e-06, %v1237_v20 }
 0x819   : > { %1834 = vrcp.f32 %v1242_v21 }
 0x81f   : > { %v1835_v25 = vpop.eup %1834 }
 0x820   : > { %v1244_v26 = vmul.f32 %v1835_v25, %v1241_v23 }
 0x822   : > { %v1248_v27 = vadd.f32 %v1807_v24, %v1244_v26 }
 0x824   : > { %1652 = vmatmul.msk.f32.vlgmr.msra.gmra.mxu3 %vm824_vm1, %v1248_v27 }
 0x8a7   : > { %v1277_v32 = vpop.f32.mrf.mxu3 }
 0x8a8   : > { %v1278_v33 = vadd.f32 %v1808_v31, %v1277_v32 }
 0x8aa   : > { %v1280_v34 = vmax.f32 %v1278_v33, 0.0 }
 0x8ac   : > { %1653 = vmatmul.msk.f32.vlgmr.msrb.gmra.mxu0 %vm1289_vm10, %v1280_v34 }
 0x928   : > { %1322 = sbr.rel (%p1654_p11) target bundleno = 2351 (0x92f), region = 108 }
 0x929   : > { %v1310_v36 = vpop.f32.mrf.mxu0 }
 0x92a   : > { %v1313_v37 = vadd.f32 %v1310_v36, %v2508_v56 }
 0x92c   : > { %v1318_v38 = vadd.f32 %v1809_v35, %v1313_v37 }
 0x92e   : > { %1323 = vst.msk [vmem:[%s2427_s20] sm:$0xff] %vm824_vm1, %v1318_v38 }
 0x92f PF: > { %p1655_p13 = scmp.ne.s32.totalorder %s2076_s27, 1 }
 0x930   : > { %s2698_s18 = sld [smem:[#allocation42_spill]] (!%p1655_p13) }
 0x931   : > { %1327 = sbr.rel (%p1655_p13) target bundleno = 2635 (0xa4b), region = 112 }
 0x936   : > { %v1330_v39 = vsel %vm824_vm1, %v1318_v38, 0.0  ;;  %v1836_v57 = vld [vmem:[#allocation8] ss:$0 sm:$0xff]  ;;  %v1837_v59 = vld [vmem:[%s2698_s18] ss:$0 sm:$0xff] }
 0x937   : > { %1331 = vadd.xlane.f32.xlu0 %v1330_v39 }
 0x9aa   : > { %v1332_v41 = vpop.xlane.xlu0 %1331 }
 0x9ab   : > { %v1333_v42 = vmul.f32 %v1332_v41, %v2436_v9 }
 0x9ad   : > { %v1334_v40 = vsub.f32 %v1318_v38, %v1333_v42 }
 0x9af   : > { %v1335_v43 = vmul.f32 %v1334_v40, %v1334_v40  ;;  %v1355_v58 = vmul.f32 %v1836_v57, %v1334_v40 }
 0x9b1   : > { %v1336_v44 = vsel %vm824_vm1, %v1335_v43, 0.0 }
 0x9b2   : > { %1337 = vadd.xlane.f32.xlu0 %v1336_v44 }
 0xa25   : > { %v1338_v45 = vpop.xlane.xlu0 %1337 }
 0xa26   : > { %v1339_v46 = vmul.f32 0.032258064, %v1338_v45 }
 0xa28   : > { %1838 = vrsqrt.f32 %v1339_v46  ;;  %vm1347_vm11 = vcmp.eq.f32.partialorder %v1339_v46, inf  ;;  %v1350_v54 = vand.u32 2147483648, %v1339_v46  ;;  %vm1349_vm12 = vcmp.eq.f32.partialorder %v1339_v46, 0.0 }
 0xa2e   : > { %v1839_v47 = vpop.eup %1838 }
 0xa2f   : > { %v1341_v48 = vmul.f32 %v1839_v47, %v1339_v46 }
 0xa31   : > { %v1342_v49 = vmul.f32 %v1839_v47, %v1341_v48 }
 0xa33   : > { %v1343_v50 = vmul.f32 0.5, %v1342_v49 }
 0xa35   : > { %v1344_v51 = vsub.f32 1.5, %v1343_v50 }
 0xa37   : > { %v1345_v52 = vmul.f32 %v1839_v47, %v1344_v51 }
 0xa39   : > { %v1346_v53 = vmul.f32 %v1345_v52, %v1339_v46 }
 0xa3b   : > { %v1348_v55 = vsel %vm1347_vm11, %v1339_v46, %v1346_v53 }
 0xa3c   : > { %v1351_v9 = vsel %vm1349_vm12, %v1350_v54, %v1348_v55 }
 0xa3d   : > { %v1356_v56 = vadd.f32 1e-06, %v1351_v9 }
 0xa3f   : > { %1840 = vrcp.f32 %v1356_v56 }
 0xa45   : > { %v1841_v60 = vpop.eup %1840 }
 0xa46   : > { %v1358_v61 = vmul.f32 %v1841_v60, %v1355_v58 }
 0xa48   : > { %v1362_v62 = vadd.f32 %v1837_v59, %v1358_v61 }
 0xa4a   : > { %1363 = vst.msk [vmem:[%s2427_s20] sm:$0xff] %vm824_vm1, %v1362_v62 }
 0xa4b PF: > { %s2699_s4 = sld [smem:[#allocation16_spill]]  ;;  %s1657_s5 = sshll.u32 %s2080_s28, 3 }
 0xa4c   : > { %s2701_s0 = sld [smem:[#allocation43_spill]]  ;;  %s1377_s9 = sshll.u32 %s2427_s20, 4  ;;  %s1378_s9 = int_to_ptr.vmem [resolvable:$true] %s1377_s9 }
 0xa51   : > { %s2703_s13 = sand.u32 1, %s2699_s4  }
 0xa52   : > { %s2702_s19 = smov %s2701_s0  ;;  %s1375_s8 = scalar_lea.hbm %s2701_s0, %s1657_s5 }
 0xa53   : > { %s1379_s16 = sshll.u32 %s1375_s8, 4  ;;  %s1365_s22 = scalar_lea.sflag [#allocation4], %s2703_s13  ;;  %s1380_s16 = int_to_ptr.hbm [resolvable:$true] %s1379_s16 }
 0xa54   : > { %s1976_s29 = sshra.s32 %s1380_s16, 4  ;;  %s1982_s28 = scalar_lea.hbm %s2702_s19, 16  ;;  %s1977_s29 = int_to_ptr.hbm [resolvable:$true] %s1976_s29 }
 0xa55   : > { %s1978_s15 = scalar_lea.hbm %s1977_s29, 8  ;;  %p1983_p4 = scmp.lt.s32.totalorder %s1977_s29, %s2702_s19 }
 0xa56   : > { %p1979_p0 = scmp.ne.s32.totalorder %s1977_s29, %s1978_s15  ;;  %p1984_p6 = scmp.lt.s32.totalorder %s1982_s28, %s1978_s15 }
 0xa58   : > { %p1980_p1 = pnand %p1979_p0, %p2310_p3  ;;  %p1985_p8 = por %p1984_p6, %p1983_p4 }
 0xa5a   : > { %p1981_p2 = pneg %p1980_p1 }
 0xa5c   : > { %p1986_p10 = pnand %p1985_p8, %p1981_p2 }
 0xa5e   : > { %1989 = shalt.err (!%p1986_p10)
}
 0xa5f   : > { %1674 = dma.vmem_to_hbm [thread:$0]  (%p2310_p3), %s1378_s9, 128, %s1380_s16, %s1365_s22  }
 0xa60 PF: > { %s2704_s20 = sld [smem:[#allocation22_spill]] }
 0xa61   : > { %s2705_s24 = sld [smem:[#allocation15_spill]] }
 0xa66   : > { %p1697_p7 = scmp.ge.s32.totalorder %s2704_s20, 2 }
 0xa67   : > { %s1391_s10 = sand.u32 1, %s2705_s24  }
 0xa68   : > { %p1691_p12 = pnand %p1697_p7, %p2315_p5  ;;  %s1392_s17 = scalar_lea.sflag [#allocation4], %s1391_s10 }
 0xa6a   : > { %p1692_p9 = pneg %p1691_p12 }
 0xa6c   : > { %2047 = dma.done.wait (%p1692_p9), %s1392_s17, 128  }
 0xa6d   : > { %2049 = vsyncadd (%p1692_p9), %s1392_s17, 4294967168  ;;  %s36_s0 = sadd.s32 1, %s2704_s20   ;;  %s2707_s21 = sld [smem:[#allocation16_spill]] }
 0xa6e   : > { %p33_p11 = scmp.ge.s32.totalorder %s36_s0, 6   ;;  %s2708_s22 = sld [smem:[#allocation17_spill]] }
 0xa6f   : > { %s2709_s23 = sld [smem:[#allocation26_spill]] }
 0xa70   : > { %s2710_s24 = sld [smem:[#allocation18_spill]] }
 0xa71   : > { %s2711_s25 = sld [smem:[#allocation19_spill]] }
 0xa72   : > { %s2712_s26 = sld [smem:[#allocation25_spill]]  ;;  %35 = sbr.rel (!%p33_p11) target bundleno = 28 (0x1c), region = 202 }
 0xa73   : > { %s2713_s27 = sld [smem:[#allocation20_spill]] }
 0xa74   : > { %s2714_s28 = sld [smem:[#allocation21_spill]] }
 0xa75   : > { %s2715_s29 = sld [smem:[#allocation23_spill]] }
 0xa76   : > { %s2716_s30 = sld [smem:[#allocation24_spill]] }
 0xa77   :  { %1398 = vsyncpa [#allocation3], 1 }
 0xa78   :  { %1400 = vsyncpa [#allocation3 + $0x1], 1 }
 0xa79   :  { %1401 = vsyncpa [#allocation6], 1 }
 0xa7a   :  { %1403 = vsyncpa [#allocation6 + $0x1], 1 }
 0xa7b   :  { %1404 = vsyncpa [#allocation9], 1 }
 0xa7c   :  { %1405 = vsyncpa [#allocation4], 1 }
 0xa7d   :  { %1407 = vsyncpa [#allocation4 + $0x1], 1 }

</bundles_post_ra>
